<compile_context>
chip_gen: v5e
topology: v5e:2x2
jax: 0.10.0
libtpu: 0.0.40
codegen_flags: <defaults>
</compile_context>

<pallas_src>
import functools

import jax
import jax.numpy as jnp
from jax.experimental import pallas as pl
from jax.experimental.pallas import tpu as pltpu


# ---------------- Config (mirrors the PyTorch `Config` object) ----------------
class Config:
    embedding_dim = 16
    hidden_dim = 32
    bidirectional = True
    num_direction = 2
    attention_size = 8
    sequence_length = 8


def _lstm_attention_kernel(x_ref, lstm_ref, head_ref, aux_ref, out_ref,
                           *, S, B, E, H, A, T):
    """Single-invocation kernel (no grid); everything fits easily in VMEM.

    x_ref    : (N, E)          embedded tokens, seq-major rows (k = t*B + b)
    lstm_ref : (E+2H+1, 8H)    [W_x ; W_h block-diag ; b_x]   (columns: fwd 4H | rev 4H,
                               each in PyTorch [i,f,g,o] order)
    head_ref : (2H+1, A+T)     [w_omega | w_cls^T ; u_omega | b_cls]
    aux_ref  : (2N+B, N)       [P ; Q ; M] 0/1 matrices encoding torch's quirky
                               exp -> reshape(-1,S) -> normalize -> permute semantics
    out_ref  : (B, T)          logits
    """
    f32 = jnp.float32
    G = 4 * H          # per-direction gate width
    D2 = 2 * H         # bidirectional hidden width
    N = S * B

    # ---------------- packed LSTM weights (loaded once) ----------------
    w_x = lstm_ref[0:E, :]                    # (E, 8H)
    w_h = lstm_ref[E:E + D2, :]               # (2H, 8H)  block-diag [fwd | rev]
    b_x = lstm_ref[E + D2:E + D2 + 1, :]      # (1, 8H)

    # ---------------- hoisted input projection ----------------
    # One well-shaped matmul for all timesteps & both directions.
    gx = jnp.dot(x_ref[...], w_x, preferred_element_type=f32) + b_x   # (N, 8H)

    # ---------------- fused bidirectional recurrence ----------------
    # carry: h2 = [h_fwd | h_rev], c2 = [c_fwd | c_rev], both (B, 2H)
    h2 = jnp.zeros((B, D2), f32)
    c2 = jnp.zeros((B, D2), f32)
    fwd_h = [None] * S
    rev_h = [None] * S
    for j in range(S):                        # statically unrolled, S is small
        tf = j                                # forward time index
        tr = S - 1 - j                        # reverse time index
        gx_step = jnp.concatenate(
            [gx[tf * B:(tf + 1) * B, 0:G],        # fwd gates' x-contribution
             gx[tr * B:(tr + 1) * B, G:2 * G]],   # rev gates' x-contribution
            axis=1)                                                   # (B, 8H)
        gates = gx_step + jnp.dot(h2, w_h, preferred_element_type=f32)  # (B, 8H)

        # Full-width transcendentals, then slice i/f/g/o per direction.
        sg = jax.nn.sigmoid(gates)
        tg = jnp.tanh(gates)
        i2 = jnp.concatenate([sg[:, 0 * H:1 * H], sg[:, G + 0 * H:G + 1 * H]], axis=1)
        f2 = jnp.concatenate([sg[:, 1 * H:2 * H], sg[:, G + 1 * H:G + 2 * H]], axis=1)
        g2 = jnp.concatenate([tg[:, 2 * H:3 * H], tg[:, G + 2 * H:G + 3 * H]], axis=1)
        o2 = jnp.concatenate([sg[:, 3 * H:4 * H], sg[:, G + 3 * H:G + 4 * H]], axis=1)

        c2 = f2 * c2 + i2 * g2
        h2 = o2 * jnp.tanh(c2)

        fwd_h[tf] = h2[:, 0:H]                # out[tf, :, :H]
        rev_h[tr] = h2[:, H:D2]               # out[tr, :, H:]

    # X == torch reshape(out, [-1, 2H]) : rows seq-major (k = t*B + b), kept in regs.
    X = jnp.concatenate(
        [jnp.concatenate([fwd_h[t], rev_h[t]], axis=1) for t in range(S)],
        axis=0)                                                        # (N, 2H)

    # ---------------- attention_net (exact torch reshape semantics) ----------------
    w_om = head_ref[0:D2, 0:A]                                         # (2H, A)
    u_row = head_ref[D2:D2 + 1, 0:A]                                   # (1, A)
    attn_tanh = jnp.tanh(jnp.dot(X, w_om, preferred_element_type=f32))  # (N, A)
    hidden = jnp.sum(attn_tanh * u_row, axis=1, keepdims=True)          # (N, 1)
    e = jnp.exp(hidden)                                                 # (N, 1)

    P = aux_ref[0:N, :]                       # (N, N) group-sum (rows of exps.reshape(-1,S))
    Q = aux_ref[N:2 * N, :]                   # (N, N) permutation alpha[b*S+s] -> row s*B+b
    M = aux_ref[2 * N:2 * N + B, :]           # (B, N) batch selection (k % B == b)

    denom = jnp.dot(P, e, preferred_element_type=f32)                   # (N, 1)
    alpha = e / denom                                                   # flat alphas
    alpha_perm = jnp.dot(Q, alpha, preferred_element_type=f32)          # (N, 1)
    attn_out = jnp.dot(M, X * alpha_perm, preferred_element_type=f32)   # (B, 2H)

    # ---------------- classify ----------------
    w_cls = head_ref[0:D2, A:A + T]                                     # (2H, T)
    b_cls = head_ref[D2:D2 + 1, A:A + T]                                # (1, T)
    logits = jnp.dot(attn_out, w_cls, preferred_element_type=f32) + b_cls
    out_ref[...] = logits.astype(out_ref.dtype)


def prepack_params(params, batch_size):
    """Hoisted, once-per-model packing of all kernel operands (feedback items 4 & 5)."""
    E, H, A, S = (Config.embedding_dim, Config.hidden_dim,
                  Config.attention_size, Config.sequence_length)
    B = batch_size
    N = S * B
    f32 = jnp.float32

    # --- LSTM slab: rows [0:E]=W_x, [E:E+2H]=W_h (block-diag), [E+2H]=b_x ---
    w_x = jnp.concatenate([params["w_ih_f"].T, params["w_ih_b"].T], axis=1)     # (E, 8H)
    zH = jnp.zeros((H, 4 * H), f32)
    w_h = jnp.concatenate([
        jnp.concatenate([params["w_hh_f"].T, zH], axis=1),
        jnp.concatenate([zH, params["w_hh_b"].T], axis=1)], axis=0)             # (2H, 8H)
    b_x = jnp.concatenate([params["b_ih_f"] + params["b_hh_f"],
                           params["b_ih_b"] + params["b_hh_b"]]).reshape(1, 8 * H)
    lstm_slab = jnp.concatenate([w_x, w_h, b_x], axis=0).astype(f32)            # (E+2H+1, 8H)

    # --- attention + classifier slab ---
    T = params["w_cls"].shape[0]
    top = jnp.concatenate([params["w_omega"], params["w_cls"].T], axis=1)       # (2H, A+T)
    bot = jnp.concatenate([params["u_omega"].reshape(1, A),
                           params["b_cls"].reshape(1, T)], axis=1)              # (1, A+T)
    head_slab = jnp.concatenate([top, bot], axis=0).astype(f32)                 # (2H+1, A+T)

    # --- aux slab: 0/1 matrices reproducing torch's reshape-based attention ---
    k = jnp.arange(N)
    P = (k[:, None] // S == k[None, :] // S).astype(f32)                        # (N, N)
    perm = (k % B) * S + (k // B)
    Q = (perm[:, None] == k[None, :]).astype(f32)                               # (N, N)
    M = ((k[None, :] % B) == jnp.arange(B)[:, None]).astype(f32)                # (B, N)
    aux = jnp.concatenate([P, Q, M], axis=0)                                    # (2N+B, N)

    return {"embed": params["embed"].astype(f32),
            "lstm": lstm_slab, "head": head_slab, "aux": aux}


@jax.jit
def lstm_attention_forward(token_ids, packed):
    B, S = token_ids.shape
    E, H, A = Config.embedding_dim, Config.hidden_dim, Config.attention_size
    assert S == Config.sequence_length
    T = packed["head"].shape[1] - A

    # Embedding lookup + permute(1,0,2) + flatten to seq-major rows (gather = XLA glue).
    emb = jnp.take(packed["embed"], token_ids, axis=0)            # (B, S, E)
    x = jnp.transpose(emb, (1, 0, 2)).reshape(S * B, E)           # (N, E), row k = t*B + b

    kernel = functools.partial(_lstm_attention_kernel,
                               S=S, B=B, E=E, H=H, A=A, T=T)
    vmem = pl.BlockSpec(memory_space=pltpu.MemorySpace.VMEM)
    return pl.pallas_call(
        kernel,
        out_shape=jax.ShapeDtypeStruct((B, T), jnp.float32),
        in_specs=[vmem, vmem, vmem, vmem],
        out_specs=vmem,
    )(x, packed["lstm"], packed["head"], packed["aux"])


def init_params(key, vocab_size, tag_size):
    E, H, A, ND = (Config.embedding_dim, Config.hidden_dim,
                   Config.attention_size, Config.num_direction)
    keys = jax.random.split(key, 11)
    ks = 1.0 / float(H) ** 0.5            # PyTorch LSTM default init scale
    cs = 1.0 / float(H * ND) ** 0.5       # PyTorch Linear default init scale

    def u(kk, shape, s):
        return jax.random.uniform(kk, shape, jnp.float32, -s, s)

    return {
        "embed":   jax.random.normal(keys[0], (vocab_size, E), jnp.float32),
        "w_ih_f":  u(keys[1], (4 * H, E), ks),
        "w_hh_f":  u(keys[2], (4 * H, H), ks),
        "b_ih_f":  u(keys[3], (4 * H,), ks),
        "b_hh_f":  u(keys[4], (4 * H,), ks),
        "w_ih_b":  u(keys[5], (4 * H, E), ks),
        "w_hh_b":  u(keys[6], (4 * H, H), ks),
        "b_ih_b":  u(keys[7], (4 * H,), ks),
        "b_hh_b":  u(keys[8], (4 * H,), ks),
        # Module __init__ uses torch.zeros for the attention parameters.
        "w_omega": jnp.zeros((ND * H, A), jnp.float32),
        "u_omega": jnp.zeros((A,), jnp.float32),
        "w_cls":   u(keys[9], (tag_size, ND * H), cs),
        "b_cls":   u(keys[10], (tag_size,), cs),
    }


if __name__ == "__main__":
    vocab_size, tag_size = 50, 5
    B, S = 2, Config.sequence_length

    key = jax.random.PRNGKey(0)
    pkey, dkey = jax.random.split(key)
    params = init_params(pkey, vocab_size, tag_size)
    packed = prepack_params(params, batch_size=B)   # once, outside the per-call path
    token_ids = jax.random.randint(dkey, (B, S), 0, vocab_size, dtype=jnp.int32)

    logits = lstm_attention_forward(token_ids, packed)
    jax.block_until_ready(logits)
    assert logits.shape == (B, tag_size) and logits.dtype == jnp.float32
    print("KERNEL_OK")
</pallas_src>

<mosaic_0001>
module attributes {stable_mosaic.version = 11 : i64} {
  func.func @_lstm_attention_kernel(%arg0: memref<16x16xf32, #tpu.memory_space<vmem>>, %arg1: memref<81x256xf32, #tpu.memory_space<vmem>>, %arg2: memref<65x13xf32, #tpu.memory_space<vmem>>, %arg3: memref<34x16xf32, #tpu.memory_space<vmem>>, %arg4: memref<2x5xf32, #tpu.memory_space<vmem>>) attributes {dimension_semantics = [], scalar_prefetch = 0 : i64, scratch_operands = 0 : i64, tpu.core_type = #tpu.core_type<tc>} {
    %c0 = arith.constant 0 : index
    %c0_0 = arith.constant 0 : index
    %0 = vector.load %arg1[%c0, %c0_0] : memref<81x256xf32, #tpu.memory_space<vmem>>, vector<16x256xf32>
    %c16 = arith.constant 16 : index
    %c0_1 = arith.constant 0 : index
    %1 = vector.load %arg1[%c16, %c0_1] : memref<81x256xf32, #tpu.memory_space<vmem>>, vector<64x256xf32>
    %c80 = arith.constant 80 : index
    %c0_2 = arith.constant 0 : index
    %2 = vector.load %arg1[%c80, %c0_2] : memref<81x256xf32, #tpu.memory_space<vmem>>, vector<1x256xf32>
    %c0_3 = arith.constant 0 : index
    %c0_4 = arith.constant 0 : index
    %3 = vector.load %arg0[%c0_3, %c0_4] : memref<16x16xf32, #tpu.memory_space<vmem>>, vector<16x16xf32>
    %cst = arith.constant dense<0.000000e+00> : vector<16x256xf32>
    %4 = tpu.matmul %3, %0, %cst {dimension_numbers = #tpu.dot_dimension_numbers<[1], [0], [0], [1], [0, 0, 1, 1], [], []>} : vector<16x16xf32>, vector<16x256xf32>, vector<16x256xf32> -> vector<16x256xf32>
    %5 = vector.broadcast %2 : vector<1x256xf32> to vector<16x256xf32>
    %6 = arith.addf %4, %5 : vector<16x256xf32>
    %cst_5 = arith.constant 0.000000e+00 : f32
    %7 = vector.broadcast %cst_5 : f32 to vector<2x64xf32>
    %cst_6 = arith.constant 0.000000e+00 : f32
    %8 = vector.broadcast %cst_6 : f32 to vector<2x64xf32>
    %9 = vector.extract_strided_slice %6 {offsets = [0, 0], sizes = [2, 128], strides = [1, 1]} : vector<16x256xf32> to vector<2x128xf32>
    %10 = vector.extract_strided_slice %6 {offsets = [14, 128], sizes = [2, 128], strides = [1, 1]} : vector<16x256xf32> to vector<2x128xf32>
    %11 = tpu.concatenate %9, %10 in 1 : vector<2x128xf32>, vector<2x128xf32> -> vector<2x256xf32>
    %cst_7 = arith.constant dense<0.000000e+00> : vector<2x256xf32>
    %12 = tpu.matmul %7, %1, %cst_7 {dimension_numbers = #tpu.dot_dimension_numbers<[1], [0], [0], [1], [0, 0, 1, 1], [], []>} : vector<2x64xf32>, vector<64x256xf32>, vector<2x256xf32> -> vector<2x256xf32>
    %13 = arith.addf %11, %12 : vector<2x256xf32>
    %14 = arith.negf %13 : vector<2x256xf32>
    %15 = math.exp %14 : vector<2x256xf32>
    %cst_8 = arith.constant 1.000000e+00 : f32
    %16 = vector.broadcast %cst_8 : f32 to vector<2x256xf32>
    %17 = arith.addf %16, %15 : vector<2x256xf32>
    %18 = arith.divf %16, %17 : vector<2x256xf32>
    %19 = math.tanh %13 : vector<2x256xf32>
    %20 = vector.extract_strided_slice %18 {offsets = [0, 0], sizes = [2, 32], strides = [1, 1]} : vector<2x256xf32> to vector<2x32xf32>
    %21 = vector.extract_strided_slice %18 {offsets = [0, 128], sizes = [2, 32], strides = [1, 1]} : vector<2x256xf32> to vector<2x32xf32>
    %22 = tpu.concatenate %20, %21 in 1 : vector<2x32xf32>, vector<2x32xf32> -> vector<2x64xf32>
    %23 = vector.extract_strided_slice %18 {offsets = [0, 32], sizes = [2, 32], strides = [1, 1]} : vector<2x256xf32> to vector<2x32xf32>
    %24 = vector.extract_strided_slice %18 {offsets = [0, 160], sizes = [2, 32], strides = [1, 1]} : vector<2x256xf32> to vector<2x32xf32>
    %25 = tpu.concatenate %23, %24 in 1 : vector<2x32xf32>, vector<2x32xf32> -> vector<2x64xf32>
    %26 = vector.extract_strided_slice %19 {offsets = [0, 64], sizes = [2, 32], strides = [1, 1]} : vector<2x256xf32> to vector<2x32xf32>
    %27 = vector.extract_strided_slice %19 {offsets = [0, 192], sizes = [2, 32], strides = [1, 1]} : vector<2x256xf32> to vector<2x32xf32>
    %28 = tpu.concatenate %26, %27 in 1 : vector<2x32xf32>, vector<2x32xf32> -> vector<2x64xf32>
    %29 = vector.extract_strided_slice %18 {offsets = [0, 96], sizes = [2, 32], strides = [1, 1]} : vector<2x256xf32> to vector<2x32xf32>
    %30 = vector.extract_strided_slice %18 {offsets = [0, 224], sizes = [2, 32], strides = [1, 1]} : vector<2x256xf32> to vector<2x32xf32>
    %31 = tpu.concatenate %29, %30 in 1 : vector<2x32xf32>, vector<2x32xf32> -> vector<2x64xf32>
    %32 = arith.mulf %25, %8 : vector<2x64xf32>
    %33 = arith.mulf %22, %28 : vector<2x64xf32>
    %34 = arith.addf %32, %33 : vector<2x64xf32>
    %35 = math.tanh %34 : vector<2x64xf32>
    %36 = arith.mulf %31, %35 : vector<2x64xf32>
    %37 = vector.extract_strided_slice %36 {offsets = [0, 0], sizes = [2, 32], strides = [1, 1]} : vector<2x64xf32> to vector<2x32xf32>
    %38 = vector.extract_strided_slice %36 {offsets = [0, 32], sizes = [2, 32], strides = [1, 1]} : vector<2x64xf32> to vector<2x32xf32>
    %39 = vector.extract_strided_slice %6 {offsets = [2, 0], sizes = [2, 128], strides = [1, 1]} : vector<16x256xf32> to vector<2x128xf32>
    %40 = vector.extract_strided_slice %6 {offsets = [12, 128], sizes = [2, 128], strides = [1, 1]} : vector<16x256xf32> to vector<2x128xf32>
    %41 = tpu.concatenate %39, %40 in 1 : vector<2x128xf32>, vector<2x128xf32> -> vector<2x256xf32>
    %cst_9 = arith.constant dense<0.000000e+00> : vector<2x256xf32>
    %42 = tpu.matmul %36, %1, %cst_9 {dimension_numbers = #tpu.dot_dimension_numbers<[1], [0], [0], [1], [0, 0, 1, 1], [], []>} : vector<2x64xf32>, vector<64x256xf32>, vector<2x256xf32> -> vector<2x256xf32>
    %43 = arith.addf %41, %42 : vector<2x256xf32>
    %44 = arith.negf %43 : vector<2x256xf32>
    %45 = math.exp %44 : vector<2x256xf32>
    %cst_10 = arith.constant 1.000000e+00 : f32
    %46 = vector.broadcast %cst_10 : f32 to vector<2x256xf32>
    %47 = arith.addf %46, %45 : vector<2x256xf32>
    %48 = arith.divf %46, %47 : vector<2x256xf32>
    %49 = math.tanh %43 : vector<2x256xf32>
    %50 = vector.extract_strided_slice %48 {offsets = [0, 0], sizes = [2, 32], strides = [1, 1]} : vector<2x256xf32> to vector<2x32xf32>
    %51 = vector.extract_strided_slice %48 {offsets = [0, 128], sizes = [2, 32], strides = [1, 1]} : vector<2x256xf32> to vector<2x32xf32>
    %52 = tpu.concatenate %50, %51 in 1 : vector<2x32xf32>, vector<2x32xf32> -> vector<2x64xf32>
    %53 = vector.extract_strided_slice %48 {offsets = [0, 32], sizes = [2, 32], strides = [1, 1]} : vector<2x256xf32> to vector<2x32xf32>
    %54 = vector.extract_strided_slice %48 {offsets = [0, 160], sizes = [2, 32], strides = [1, 1]} : vector<2x256xf32> to vector<2x32xf32>
    %55 = tpu.concatenate %53, %54 in 1 : vector<2x32xf32>, vector<2x32xf32> -> vector<2x64xf32>
    %56 = vector.extract_strided_slice %49 {offsets = [0, 64], sizes = [2, 32], strides = [1, 1]} : vector<2x256xf32> to vector<2x32xf32>
    %57 = vector.extract_strided_slice %49 {offsets = [0, 192], sizes = [2, 32], strides = [1, 1]} : vector<2x256xf32> to vector<2x32xf32>
    %58 = tpu.concatenate %56, %57 in 1 : vector<2x32xf32>, vector<2x32xf32> -> vector<2x64xf32>
    %59 = vector.extract_strided_slice %48 {offsets = [0, 96], sizes = [2, 32], strides = [1, 1]} : vector<2x256xf32> to vector<2x32xf32>
    %60 = vector.extract_strided_slice %48 {offsets = [0, 224], sizes = [2, 32], strides = [1, 1]} : vector<2x256xf32> to vector<2x32xf32>
    %61 = tpu.concatenate %59, %60 in 1 : vector<2x32xf32>, vector<2x32xf32> -> vector<2x64xf32>
    %62 = arith.mulf %55, %34 : vector<2x64xf32>
    %63 = arith.mulf %52, %58 : vector<2x64xf32>
    %64 = arith.addf %62, %63 : vector<2x64xf32>
    %65 = math.tanh %64 : vector<2x64xf32>
    %66 = arith.mulf %61, %65 : vector<2x64xf32>
    %67 = vector.extract_strided_slice %66 {offsets = [0, 0], sizes = [2, 32], strides = [1, 1]} : vector<2x64xf32> to vector<2x32xf32>
    %68 = vector.extract_strided_slice %66 {offsets = [0, 32], sizes = [2, 32], strides = [1, 1]} : vector<2x64xf32> to vector<2x32xf32>
    %69 = vector.extract_strided_slice %6 {offsets = [4, 0], sizes = [2, 128], strides = [1, 1]} : vector<16x256xf32> to vector<2x128xf32>
    %70 = vector.extract_strided_slice %6 {offsets = [10, 128], sizes = [2, 128], strides = [1, 1]} : vector<16x256xf32> to vector<2x128xf32>
    %71 = tpu.concatenate %69, %70 in 1 : vector<2x128xf32>, vector<2x128xf32> -> vector<2x256xf32>
    %cst_11 = arith.constant dense<0.000000e+00> : vector<2x256xf32>
    %72 = tpu.matmul %66, %1, %cst_11 {dimension_numbers = #tpu.dot_dimension_numbers<[1], [0], [0], [1], [0, 0, 1, 1], [], []>} : vector<2x64xf32>, vector<64x256xf32>, vector<2x256xf32> -> vector<2x256xf32>
    %73 = arith.addf %71, %72 : vector<2x256xf32>
    %74 = arith.negf %73 : vector<2x256xf32>
    %75 = math.exp %74 : vector<2x256xf32>
    %cst_12 = arith.constant 1.000000e+00 : f32
    %76 = vector.broadcast %cst_12 : f32 to vector<2x256xf32>
    %77 = arith.addf %76, %75 : vector<2x256xf32>
    %78 = arith.divf %76, %77 : vector<2x256xf32>
    %79 = math.tanh %73 : vector<2x256xf32>
    %80 = vector.extract_strided_slice %78 {offsets = [0, 0], sizes = [2, 32], strides = [1, 1]} : vector<2x256xf32> to vector<2x32xf32>
    %81 = vector.extract_strided_slice %78 {offsets = [0, 128], sizes = [2, 32], strides = [1, 1]} : vector<2x256xf32> to vector<2x32xf32>
    %82 = tpu.concatenate %80, %81 in 1 : vector<2x32xf32>, vector<2x32xf32> -> vector<2x64xf32>
    %83 = vector.extract_strided_slice %78 {offsets = [0, 32], sizes = [2, 32], strides = [1, 1]} : vector<2x256xf32> to vector<2x32xf32>
    %84 = vector.extract_strided_slice %78 {offsets = [0, 160], sizes = [2, 32], strides = [1, 1]} : vector<2x256xf32> to vector<2x32xf32>
    %85 = tpu.concatenate %83, %84 in 1 : vector<2x32xf32>, vector<2x32xf32> -> vector<2x64xf32>
    %86 = vector.extract_strided_slice %79 {offsets = [0, 64], sizes = [2, 32], strides = [1, 1]} : vector<2x256xf32> to vector<2x32xf32>
    %87 = vector.extract_strided_slice %79 {offsets = [0, 192], sizes = [2, 32], strides = [1, 1]} : vector<2x256xf32> to vector<2x32xf32>
    %88 = tpu.concatenate %86, %87 in 1 : vector<2x32xf32>, vector<2x32xf32> -> vector<2x64xf32>
    %89 = vector.extract_strided_slice %78 {offsets = [0, 96], sizes = [2, 32], strides = [1, 1]} : vector<2x256xf32> to vector<2x32xf32>
    %90 = vector.extract_strided_slice %78 {offsets = [0, 224], sizes = [2, 32], strides = [1, 1]} : vector<2x256xf32> to vector<2x32xf32>
    %91 = tpu.concatenate %89, %90 in 1 : vector<2x32xf32>, vector<2x32xf32> -> vector<2x64xf32>
    %92 = arith.mulf %85, %64 : vector<2x64xf32>
    %93 = arith.mulf %82, %88 : vector<2x64xf32>
    %94 = arith.addf %92, %93 : vector<2x64xf32>
    %95 = math.tanh %94 : vector<2x64xf32>
    %96 = arith.mulf %91, %95 : vector<2x64xf32>
    %97 = vector.extract_strided_slice %96 {offsets = [0, 0], sizes = [2, 32], strides = [1, 1]} : vector<2x64xf32> to vector<2x32xf32>
    %98 = vector.extract_strided_slice %96 {offsets = [0, 32], sizes = [2, 32], strides = [1, 1]} : vector<2x64xf32> to vector<2x32xf32>
    %99 = vector.extract_strided_slice %6 {offsets = [6, 0], sizes = [2, 128], strides = [1, 1]} : vector<16x256xf32> to vector<2x128xf32>
    %100 = vector.extract_strided_slice %6 {offsets = [8, 128], sizes = [2, 128], strides = [1, 1]} : vector<16x256xf32> to vector<2x128xf32>
    %101 = tpu.concatenate %99, %100 in 1 : vector<2x128xf32>, vector<2x128xf32> -> vector<2x256xf32>
    %cst_13 = arith.constant dense<0.000000e+00> : vector<2x256xf32>
    %102 = tpu.matmul %96, %1, %cst_13 {dimension_numbers = #tpu.dot_dimension_numbers<[1], [0], [0], [1], [0, 0, 1, 1], [], []>} : vector<2x64xf32>, vector<64x256xf32>, vector<2x256xf32> -> vector<2x256xf32>
    %103 = arith.addf %101, %102 : vector<2x256xf32>
    %104 = arith.negf %103 : vector<2x256xf32>
    %105 = math.exp %104 : vector<2x256xf32>
    %cst_14 = arith.constant 1.000000e+00 : f32
    %106 = vector.broadcast %cst_14 : f32 to vector<2x256xf32>
    %107 = arith.addf %106, %105 : vector<2x256xf32>
    %108 = arith.divf %106, %107 : vector<2x256xf32>
    %109 = math.tanh %103 : vector<2x256xf32>
    %110 = vector.extract_strided_slice %108 {offsets = [0, 0], sizes = [2, 32], strides = [1, 1]} : vector<2x256xf32> to vector<2x32xf32>
    %111 = vector.extract_strided_slice %108 {offsets = [0, 128], sizes = [2, 32], strides = [1, 1]} : vector<2x256xf32> to vector<2x32xf32>
    %112 = tpu.concatenate %110, %111 in 1 : vector<2x32xf32>, vector<2x32xf32> -> vector<2x64xf32>
    %113 = vector.extract_strided_slice %108 {offsets = [0, 32], sizes = [2, 32], strides = [1, 1]} : vector<2x256xf32> to vector<2x32xf32>
    %114 = vector.extract_strided_slice %108 {offsets = [0, 160], sizes = [2, 32], strides = [1, 1]} : vector<2x256xf32> to vector<2x32xf32>
    %115 = tpu.concatenate %113, %114 in 1 : vector<2x32xf32>, vector<2x32xf32> -> vector<2x64xf32>
    %116 = vector.extract_strided_slice %109 {offsets = [0, 64], sizes = [2, 32], strides = [1, 1]} : vector<2x256xf32> to vector<2x32xf32>
    %117 = vector.extract_strided_slice %109 {offsets = [0, 192], sizes = [2, 32], strides = [1, 1]} : vector<2x256xf32> to vector<2x32xf32>
    %118 = tpu.concatenate %116, %117 in 1 : vector<2x32xf32>, vector<2x32xf32> -> vector<2x64xf32>
    %119 = vector.extract_strided_slice %108 {offsets = [0, 96], sizes = [2, 32], strides = [1, 1]} : vector<2x256xf32> to vector<2x32xf32>
    %120 = vector.extract_strided_slice %108 {offsets = [0, 224], sizes = [2, 32], strides = [1, 1]} : vector<2x256xf32> to vector<2x32xf32>
    %121 = tpu.concatenate %119, %120 in 1 : vector<2x32xf32>, vector<2x32xf32> -> vector<2x64xf32>
    %122 = arith.mulf %115, %94 : vector<2x64xf32>
    %123 = arith.mulf %112, %118 : vector<2x64xf32>
    %124 = arith.addf %122, %123 : vector<2x64xf32>
    %125 = math.tanh %124 : vector<2x64xf32>
    %126 = arith.mulf %121, %125 : vector<2x64xf32>
    %127 = vector.extract_strided_slice %126 {offsets = [0, 0], sizes = [2, 32], strides = [1, 1]} : vector<2x64xf32> to vector<2x32xf32>
    %128 = vector.extract_strided_slice %126 {offsets = [0, 32], sizes = [2, 32], strides = [1, 1]} : vector<2x64xf32> to vector<2x32xf32>
    %129 = vector.extract_strided_slice %6 {offsets = [8, 0], sizes = [2, 128], strides = [1, 1]} : vector<16x256xf32> to vector<2x128xf32>
    %130 = vector.extract_strided_slice %6 {offsets = [6, 128], sizes = [2, 128], strides = [1, 1]} : vector<16x256xf32> to vector<2x128xf32>
    %131 = tpu.concatenate %129, %130 in 1 : vector<2x128xf32>, vector<2x128xf32> -> vector<2x256xf32>
    %cst_15 = arith.constant dense<0.000000e+00> : vector<2x256xf32>
    %132 = tpu.matmul %126, %1, %cst_15 {dimension_numbers = #tpu.dot_dimension_numbers<[1], [0], [0], [1], [0, 0, 1, 1], [], []>} : vector<2x64xf32>, vector<64x256xf32>, vector<2x256xf32> -> vector<2x256xf32>
    %133 = arith.addf %131, %132 : vector<2x256xf32>
    %134 = arith.negf %133 : vector<2x256xf32>
    %135 = math.exp %134 : vector<2x256xf32>
    %cst_16 = arith.constant 1.000000e+00 : f32
    %136 = vector.broadcast %cst_16 : f32 to vector<2x256xf32>
    %137 = arith.addf %136, %135 : vector<2x256xf32>
    %138 = arith.divf %136, %137 : vector<2x256xf32>
    %139 = math.tanh %133 : vector<2x256xf32>
    %140 = vector.extract_strided_slice %138 {offsets = [0, 0], sizes = [2, 32], strides = [1, 1]} : vector<2x256xf32> to vector<2x32xf32>
    %141 = vector.extract_strided_slice %138 {offsets = [0, 128], sizes = [2, 32], strides = [1, 1]} : vector<2x256xf32> to vector<2x32xf32>
    %142 = tpu.concatenate %140, %141 in 1 : vector<2x32xf32>, vector<2x32xf32> -> vector<2x64xf32>
    %143 = vector.extract_strided_slice %138 {offsets = [0, 32], sizes = [2, 32], strides = [1, 1]} : vector<2x256xf32> to vector<2x32xf32>
    %144 = vector.extract_strided_slice %138 {offsets = [0, 160], sizes = [2, 32], strides = [1, 1]} : vector<2x256xf32> to vector<2x32xf32>
    %145 = tpu.concatenate %143, %144 in 1 : vector<2x32xf32>, vector<2x32xf32> -> vector<2x64xf32>
    %146 = vector.extract_strided_slice %139 {offsets = [0, 64], sizes = [2, 32], strides = [1, 1]} : vector<2x256xf32> to vector<2x32xf32>
    %147 = vector.extract_strided_slice %139 {offsets = [0, 192], sizes = [2, 32], strides = [1, 1]} : vector<2x256xf32> to vector<2x32xf32>
    %148 = tpu.concatenate %146, %147 in 1 : vector<2x32xf32>, vector<2x32xf32> -> vector<2x64xf32>
    %149 = vector.extract_strided_slice %138 {offsets = [0, 96], sizes = [2, 32], strides = [1, 1]} : vector<2x256xf32> to vector<2x32xf32>
    %150 = vector.extract_strided_slice %138 {offsets = [0, 224], sizes = [2, 32], strides = [1, 1]} : vector<2x256xf32> to vector<2x32xf32>
    %151 = tpu.concatenate %149, %150 in 1 : vector<2x32xf32>, vector<2x32xf32> -> vector<2x64xf32>
    %152 = arith.mulf %145, %124 : vector<2x64xf32>
    %153 = arith.mulf %142, %148 : vector<2x64xf32>
    %154 = arith.addf %152, %153 : vector<2x64xf32>
    %155 = math.tanh %154 : vector<2x64xf32>
    %156 = arith.mulf %151, %155 : vector<2x64xf32>
    %157 = vector.extract_strided_slice %156 {offsets = [0, 0], sizes = [2, 32], strides = [1, 1]} : vector<2x64xf32> to vector<2x32xf32>
    %158 = vector.extract_strided_slice %156 {offsets = [0, 32], sizes = [2, 32], strides = [1, 1]} : vector<2x64xf32> to vector<2x32xf32>
    %159 = vector.extract_strided_slice %6 {offsets = [10, 0], sizes = [2, 128], strides = [1, 1]} : vector<16x256xf32> to vector<2x128xf32>
    %160 = vector.extract_strided_slice %6 {offsets = [4, 128], sizes = [2, 128], strides = [1, 1]} : vector<16x256xf32> to vector<2x128xf32>
    %161 = tpu.concatenate %159, %160 in 1 : vector<2x128xf32>, vector<2x128xf32> -> vector<2x256xf32>
    %cst_17 = arith.constant dense<0.000000e+00> : vector<2x256xf32>
    %162 = tpu.matmul %156, %1, %cst_17 {dimension_numbers = #tpu.dot_dimension_numbers<[1], [0], [0], [1], [0, 0, 1, 1], [], []>} : vector<2x64xf32>, vector<64x256xf32>, vector<2x256xf32> -> vector<2x256xf32>
    %163 = arith.addf %161, %162 : vector<2x256xf32>
    %164 = arith.negf %163 : vector<2x256xf32>
    %165 = math.exp %164 : vector<2x256xf32>
    %cst_18 = arith.constant 1.000000e+00 : f32
    %166 = vector.broadcast %cst_18 : f32 to vector<2x256xf32>
    %167 = arith.addf %166, %165 : vector<2x256xf32>
    %168 = arith.divf %166, %167 : vector<2x256xf32>
    %169 = math.tanh %163 : vector<2x256xf32>
    %170 = vector.extract_strided_slice %168 {offsets = [0, 0], sizes = [2, 32], strides = [1, 1]} : vector<2x256xf32> to vector<2x32xf32>
    %171 = vector.extract_strided_slice %168 {offsets = [0, 128], sizes = [2, 32], strides = [1, 1]} : vector<2x256xf32> to vector<2x32xf32>
    %172 = tpu.concatenate %170, %171 in 1 : vector<2x32xf32>, vector<2x32xf32> -> vector<2x64xf32>
    %173 = vector.extract_strided_slice %168 {offsets = [0, 32], sizes = [2, 32], strides = [1, 1]} : vector<2x256xf32> to vector<2x32xf32>
    %174 = vector.extract_strided_slice %168 {offsets = [0, 160], sizes = [2, 32], strides = [1, 1]} : vector<2x256xf32> to vector<2x32xf32>
    %175 = tpu.concatenate %173, %174 in 1 : vector<2x32xf32>, vector<2x32xf32> -> vector<2x64xf32>
    %176 = vector.extract_strided_slice %169 {offsets = [0, 64], sizes = [2, 32], strides = [1, 1]} : vector<2x256xf32> to vector<2x32xf32>
    %177 = vector.extract_strided_slice %169 {offsets = [0, 192], sizes = [2, 32], strides = [1, 1]} : vector<2x256xf32> to vector<2x32xf32>
    %178 = tpu.concatenate %176, %177 in 1 : vector<2x32xf32>, vector<2x32xf32> -> vector<2x64xf32>
    %179 = vector.extract_strided_slice %168 {offsets = [0, 96], sizes = [2, 32], strides = [1, 1]} : vector<2x256xf32> to vector<2x32xf32>
    %180 = vector.extract_strided_slice %168 {offsets = [0, 224], sizes = [2, 32], strides = [1, 1]} : vector<2x256xf32> to vector<2x32xf32>
    %181 = tpu.concatenate %179, %180 in 1 : vector<2x32xf32>, vector<2x32xf32> -> vector<2x64xf32>
    %182 = arith.mulf %175, %154 : vector<2x64xf32>
    %183 = arith.mulf %172, %178 : vector<2x64xf32>
    %184 = arith.addf %182, %183 : vector<2x64xf32>
    %185 = math.tanh %184 : vector<2x64xf32>
    %186 = arith.mulf %181, %185 : vector<2x64xf32>
    %187 = vector.extract_strided_slice %186 {offsets = [0, 0], sizes = [2, 32], strides = [1, 1]} : vector<2x64xf32> to vector<2x32xf32>
    %188 = vector.extract_strided_slice %186 {offsets = [0, 32], sizes = [2, 32], strides = [1, 1]} : vector<2x64xf32> to vector<2x32xf32>
    %189 = vector.extract_strided_slice %6 {offsets = [12, 0], sizes = [2, 128], strides = [1, 1]} : vector<16x256xf32> to vector<2x128xf32>
    %190 = vector.extract_strided_slice %6 {offsets = [2, 128], sizes = [2, 128], strides = [1, 1]} : vector<16x256xf32> to vector<2x128xf32>
    %191 = tpu.concatenate %189, %190 in 1 : vector<2x128xf32>, vector<2x128xf32> -> vector<2x256xf32>
    %cst_19 = arith.constant dense<0.000000e+00> : vector<2x256xf32>
    %192 = tpu.matmul %186, %1, %cst_19 {dimension_numbers = #tpu.dot_dimension_numbers<[1], [0], [0], [1], [0, 0, 1, 1], [], []>} : vector<2x64xf32>, vector<64x256xf32>, vector<2x256xf32> -> vector<2x256xf32>
    %193 = arith.addf %191, %192 : vector<2x256xf32>
    %194 = arith.negf %193 : vector<2x256xf32>
    %195 = math.exp %194 : vector<2x256xf32>
    %cst_20 = arith.constant 1.000000e+00 : f32
    %196 = vector.broadcast %cst_20 : f32 to vector<2x256xf32>
    %197 = arith.addf %196, %195 : vector<2x256xf32>
    %198 = arith.divf %196, %197 : vector<2x256xf32>
    %199 = math.tanh %193 : vector<2x256xf32>
    %200 = vector.extract_strided_slice %198 {offsets = [0, 0], sizes = [2, 32], strides = [1, 1]} : vector<2x256xf32> to vector<2x32xf32>
    %201 = vector.extract_strided_slice %198 {offsets = [0, 128], sizes = [2, 32], strides = [1, 1]} : vector<2x256xf32> to vector<2x32xf32>
    %202 = tpu.concatenate %200, %201 in 1 : vector<2x32xf32>, vector<2x32xf32> -> vector<2x64xf32>
    %203 = vector.extract_strided_slice %198 {offsets = [0, 32], sizes = [2, 32], strides = [1, 1]} : vector<2x256xf32> to vector<2x32xf32>
    %204 = vector.extract_strided_slice %198 {offsets = [0, 160], sizes = [2, 32], strides = [1, 1]} : vector<2x256xf32> to vector<2x32xf32>
    %205 = tpu.concatenate %203, %204 in 1 : vector<2x32xf32>, vector<2x32xf32> -> vector<2x64xf32>
    %206 = vector.extract_strided_slice %199 {offsets = [0, 64], sizes = [2, 32], strides = [1, 1]} : vector<2x256xf32> to vector<2x32xf32>
    %207 = vector.extract_strided_slice %199 {offsets = [0, 192], sizes = [2, 32], strides = [1, 1]} : vector<2x256xf32> to vector<2x32xf32>
    %208 = tpu.concatenate %206, %207 in 1 : vector<2x32xf32>, vector<2x32xf32> -> vector<2x64xf32>
    %209 = vector.extract_strided_slice %198 {offsets = [0, 96], sizes = [2, 32], strides = [1, 1]} : vector<2x256xf32> to vector<2x32xf32>
    %210 = vector.extract_strided_slice %198 {offsets = [0, 224], sizes = [2, 32], strides = [1, 1]} : vector<2x256xf32> to vector<2x32xf32>
    %211 = tpu.concatenate %209, %210 in 1 : vector<2x32xf32>, vector<2x32xf32> -> vector<2x64xf32>
    %212 = arith.mulf %205, %184 : vector<2x64xf32>
    %213 = arith.mulf %202, %208 : vector<2x64xf32>
    %214 = arith.addf %212, %213 : vector<2x64xf32>
    %215 = math.tanh %214 : vector<2x64xf32>
    %216 = arith.mulf %211, %215 : vector<2x64xf32>
    %217 = vector.extract_strided_slice %216 {offsets = [0, 0], sizes = [2, 32], strides = [1, 1]} : vector<2x64xf32> to vector<2x32xf32>
    %218 = vector.extract_strided_slice %216 {offsets = [0, 32], sizes = [2, 32], strides = [1, 1]} : vector<2x64xf32> to vector<2x32xf32>
    %219 = vector.extract_strided_slice %6 {offsets = [14, 0], sizes = [2, 128], strides = [1, 1]} : vector<16x256xf32> to vector<2x128xf32>
    %220 = vector.extract_strided_slice %6 {offsets = [0, 128], sizes = [2, 128], strides = [1, 1]} : vector<16x256xf32> to vector<2x128xf32>
    %221 = tpu.concatenate %219, %220 in 1 : vector<2x128xf32>, vector<2x128xf32> -> vector<2x256xf32>
    %cst_21 = arith.constant dense<0.000000e+00> : vector<2x256xf32>
    %222 = tpu.matmul %216, %1, %cst_21 {dimension_numbers = #tpu.dot_dimension_numbers<[1], [0], [0], [1], [0, 0, 1, 1], [], []>} : vector<2x64xf32>, vector<64x256xf32>, vector<2x256xf32> -> vector<2x256xf32>
    %223 = arith.addf %221, %222 : vector<2x256xf32>
    %224 = arith.negf %223 : vector<2x256xf32>
    %225 = math.exp %224 : vector<2x256xf32>
    %cst_22 = arith.constant 1.000000e+00 : f32
    %226 = vector.broadcast %cst_22 : f32 to vector<2x256xf32>
    %227 = arith.addf %226, %225 : vector<2x256xf32>
    %228 = arith.divf %226, %227 : vector<2x256xf32>
    %229 = math.tanh %223 : vector<2x256xf32>
    %230 = vector.extract_strided_slice %228 {offsets = [0, 0], sizes = [2, 32], strides = [1, 1]} : vector<2x256xf32> to vector<2x32xf32>
    %231 = vector.extract_strided_slice %228 {offsets = [0, 128], sizes = [2, 32], strides = [1, 1]} : vector<2x256xf32> to vector<2x32xf32>
    %232 = tpu.concatenate %230, %231 in 1 : vector<2x32xf32>, vector<2x32xf32> -> vector<2x64xf32>
    %233 = vector.extract_strided_slice %228 {offsets = [0, 32], sizes = [2, 32], strides = [1, 1]} : vector<2x256xf32> to vector<2x32xf32>
    %234 = vector.extract_strided_slice %228 {offsets = [0, 160], sizes = [2, 32], strides = [1, 1]} : vector<2x256xf32> to vector<2x32xf32>
    %235 = tpu.concatenate %233, %234 in 1 : vector<2x32xf32>, vector<2x32xf32> -> vector<2x64xf32>
    %236 = vector.extract_strided_slice %229 {offsets = [0, 64], sizes = [2, 32], strides = [1, 1]} : vector<2x256xf32> to vector<2x32xf32>
    %237 = vector.extract_strided_slice %229 {offsets = [0, 192], sizes = [2, 32], strides = [1, 1]} : vector<2x256xf32> to vector<2x32xf32>
    %238 = tpu.concatenate %236, %237 in 1 : vector<2x32xf32>, vector<2x32xf32> -> vector<2x64xf32>
    %239 = vector.extract_strided_slice %228 {offsets = [0, 96], sizes = [2, 32], strides = [1, 1]} : vector<2x256xf32> to vector<2x32xf32>
    %240 = vector.extract_strided_slice %228 {offsets = [0, 224], sizes = [2, 32], strides = [1, 1]} : vector<2x256xf32> to vector<2x32xf32>
    %241 = tpu.concatenate %239, %240 in 1 : vector<2x32xf32>, vector<2x32xf32> -> vector<2x64xf32>
    %242 = arith.mulf %235, %214 : vector<2x64xf32>
    %243 = arith.mulf %232, %238 : vector<2x64xf32>
    %244 = arith.addf %242, %243 : vector<2x64xf32>
    %245 = math.tanh %244 : vector<2x64xf32>
    %246 = arith.mulf %241, %245 : vector<2x64xf32>
    %247 = vector.extract_strided_slice %246 {offsets = [0, 0], sizes = [2, 32], strides = [1, 1]} : vector<2x64xf32> to vector<2x32xf32>
    %248 = vector.extract_strided_slice %246 {offsets = [0, 32], sizes = [2, 32], strides = [1, 1]} : vector<2x64xf32> to vector<2x32xf32>
    %249 = tpu.concatenate %37, %248 in 1 : vector<2x32xf32>, vector<2x32xf32> -> vector<2x64xf32>
    %250 = tpu.concatenate %67, %218 in 1 : vector<2x32xf32>, vector<2x32xf32> -> vector<2x64xf32>
    %251 = tpu.concatenate %97, %188 in 1 : vector<2x32xf32>, vector<2x32xf32> -> vector<2x64xf32>
    %252 = tpu.concatenate %127, %158 in 1 : vector<2x32xf32>, vector<2x32xf32> -> vector<2x64xf32>
    %253 = tpu.concatenate %157, %128 in 1 : vector<2x32xf32>, vector<2x32xf32> -> vector<2x64xf32>
    %254 = tpu.concatenate %187, %98 in 1 : vector<2x32xf32>, vector<2x32xf32> -> vector<2x64xf32>
    %255 = tpu.concatenate %217, %68 in 1 : vector<2x32xf32>, vector<2x32xf32> -> vector<2x64xf32>
    %256 = tpu.concatenate %247, %38 in 1 : vector<2x32xf32>, vector<2x32xf32> -> vector<2x64xf32>
    %257 = tpu.concatenate %249, %250, %251, %252, %253, %254, %255, %256 in 0 : vector<2x64xf32>, vector<2x64xf32>, vector<2x64xf32>, vector<2x64xf32>, vector<2x64xf32>, vector<2x64xf32>, vector<2x64xf32>, vector<2x64xf32> -> vector<16x64xf32>
    %c0_23 = arith.constant 0 : index
    %c0_24 = arith.constant 0 : index
    %258 = vector.load %arg2[%c0_23, %c0_24] : memref<65x13xf32, #tpu.memory_space<vmem>>, vector<64x8xf32>
    %c64 = arith.constant 64 : index
    %c0_25 = arith.constant 0 : index
    %259 = vector.load %arg2[%c64, %c0_25] : memref<65x13xf32, #tpu.memory_space<vmem>>, vector<1x8xf32>
    %cst_26 = arith.constant dense<0.000000e+00> : vector<16x8xf32>
    %260 = tpu.matmul %257, %258, %cst_26 {dimension_numbers = #tpu.dot_dimension_numbers<[1], [0], [0], [1], [0, 0, 1, 1], [], []>} : vector<16x64xf32>, vector<64x8xf32>, vector<16x8xf32> -> vector<16x8xf32>
    %261 = math.tanh %260 : vector<16x8xf32>
    %262 = vector.broadcast %259 : vector<1x8xf32> to vector<16x8xf32>
    %263 = arith.mulf %261, %262 : vector<16x8xf32>
    %cst_27 = arith.constant dense<0.000000e+00> : vector<16xf32>
    %264 = vector.multi_reduction <add>, %263, %cst_27 [1] : vector<16x8xf32> to vector<16xf32>
    %265 = vector.shape_cast %264 : vector<16xf32> to vector<16x1xf32>
    %266 = math.exp %265 : vector<16x1xf32>
    %c0_28 = arith.constant 0 : index
    %c0_29 = arith.constant 0 : index
    %267 = vector.load %arg3[%c0_28, %c0_29] : memref<34x16xf32, #tpu.memory_space<vmem>>, vector<16x16xf32>
    %c16_30 = arith.constant 16 : index
    %c0_31 = arith.constant 0 : index
    %268 = vector.load %arg3[%c16_30, %c0_31] : memref<34x16xf32, #tpu.memory_space<vmem>>, vector<16x16xf32>
    %c32 = arith.constant 32 : index
    %c0_32 = arith.constant 0 : index
    %269 = vector.load %arg3[%c32, %c0_32] : memref<34x16xf32, #tpu.memory_space<vmem>>, vector<2x16xf32>
    %cst_33 = arith.constant dense<0.000000e+00> : vector<16x1xf32>
    %270 = tpu.matmul %267, %266, %cst_33 {dimension_numbers = #tpu.dot_dimension_numbers<[1], [0], [0], [1], [0, 0, 1, 1], [], []>} : vector<16x16xf32>, vector<16x1xf32>, vector<16x1xf32> -> vector<16x1xf32>
    %271 = arith.divf %266, %270 : vector<16x1xf32>
    %cst_34 = arith.constant dense<0.000000e+00> : vector<16x1xf32>
    %272 = tpu.matmul %268, %271, %cst_34 {dimension_numbers = #tpu.dot_dimension_numbers<[1], [0], [0], [1], [0, 0, 1, 1], [], []>} : vector<16x16xf32>, vector<16x1xf32>, vector<16x1xf32> -> vector<16x1xf32>
    %273 = vector.broadcast %272 : vector<16x1xf32> to vector<16x64xf32>
    %274 = arith.mulf %257, %273 : vector<16x64xf32>
    %cst_35 = arith.constant dense<0.000000e+00> : vector<2x64xf32>
    %275 = tpu.matmul %269, %274, %cst_35 {dimension_numbers = #tpu.dot_dimension_numbers<[1], [0], [0], [1], [0, 0, 1, 1], [], []>} : vector<2x16xf32>, vector<16x64xf32>, vector<2x64xf32> -> vector<2x64xf32>
    %c0_36 = arith.constant 0 : index
    %c8 = arith.constant 8 : index
    %276 = vector.load %arg2[%c0_36, %c8] : memref<65x13xf32, #tpu.memory_space<vmem>>, vector<64x5xf32>
    %c64_37 = arith.constant 64 : index
    %c8_38 = arith.constant 8 : index
    %277 = vector.load %arg2[%c64_37, %c8_38] : memref<65x13xf32, #tpu.memory_space<vmem>>, vector<1x5xf32>
    %cst_39 = arith.constant dense<0.000000e+00> : vector<2x5xf32>
    %278 = tpu.matmul %275, %276, %cst_39 {dimension_numbers = #tpu.dot_dimension_numbers<[1], [0], [0], [1], [0, 0, 1, 1], [], []>} : vector<2x64xf32>, vector<64x5xf32>, vector<2x5xf32> -> vector<2x5xf32>
    %279 = vector.broadcast %277 : vector<1x5xf32> to vector<2x5xf32>
    %280 = arith.addf %278, %279 : vector<2x5xf32>
    %c0_40 = arith.constant 0 : index
    %c0_41 = arith.constant 0 : index
    %281 = vector.load %arg4[%c0_40, %c0_41] : memref<2x5xf32, #tpu.memory_space<vmem>>, vector<2x5xf32>
    tpu.vector_store %arg4[%c0_40, %c0_41], %280 {strides = array<i32>} : memref<2x5xf32, #tpu.memory_space<vmem>>, vector<2x5xf32>,
    return
  }
}

</mosaic_0001>

<bundles_post_ra>
// kernel: lstm_attention_forward.1
= control target key start
LH: loop header
LB: loop body
LE: loop exit
PB: predicated region body
PF: predicated region fallthrough
CT: control target
= control target key end

     0   :  { %vm47_vm0 = vcmask 130048   ;;  %s2220_s0 = inlined_call_operand.vmem [shape: f32[16,16], index: 0, kind: input, shape index: {}]   ;;  %s2221_s1 = inlined_call_operand.vmem [shape: f32[81,256], index: 1, kind: input, shape index: {}]   ;;  %s2222_s2 = inlined_call_operand.vmem [shape: f32[65,13], index: 2, kind: input, shape index: {}]   ;;  %s2223_s3 = inlined_call_operand.vmem [shape: f32[34,16], index: 3, kind: input, shape index: {}]   ;;  %s2224_s4 = inlined_call_operand.hbm [shape: f32[2,5], index: 4, kind: output, shape index: {}]  }
   0x1   :  { %v1652_v0 = vld [vmem:[%s2221_s1 + $0x90] sm:$0xff]  ;;  %v1657_v1 = vld [vmem:[%s2221_s1 + $0x98] sm:$0xff]  ;;  %v1662_v2 = vld [vmem:[%s2221_s1 + $0x80] sm:$0xff] }
   0x2   :  { %115 = vmatpush.msra.mxu2 %v1652_v0  ;;  %135 = vmatpush.msra.mxu3 %v1657_v1  ;;  %v1669_v3 = vld [vmem:[%s2221_s1 + $0x88] sm:$0xff]  ;;  %v1674_v4 = vld [vmem:[%s2221_s1 + $0x70] sm:$0xff]  ;;  %v1679_v5 = vld [vmem:[%s2221_s1 + $0x78] sm:$0xff] }
   0x3   :  { %v21_v6 = vld [vmem:[%s2221_s1 + $0x18] sm:$0xff]  ;;  %v19_v7 = vld [vmem:[%s2221_s1 + $0x8] sm:$0xff]  ;;  %v1692_v8 = vld [vmem:[%s2221_s1 + $0x60] sm:$0xff] }
   0x4   :  { %116 = vmatpush.msra.mxu2 %v1662_v2  ;;  %136 = vmatpush.msra.mxu3 %v1669_v3  ;;  %v1697_v9 = vld [vmem:[%s2221_s1 + $0x68] sm:$0xff]  ;;  %v40_v10 = vld [vmem:[%s2220_s0] sm:$0xff]  ;;  %v1707_v11 = vld [vmem:[%s2221_s1 + $0x50] sm:$0xff] }
   0x5   :  { %91 = vmatpush.msra.mxu1 %v21_v6  ;;  %v1712_v12 = vld [vmem:[%s2221_s1 + $0x58] sm:$0xff]  ;;  %v20_v13 = vld [vmem:[%s2221_s1 + $0x10] sm:$0xff]  ;;  %v18_v14 = vld [vmem:[%s2221_s1] sm:$0xff] }
   0x6   :  { %117 = vmatpush.msra.mxu2 %v1674_v4  ;;  %137 = vmatpush.msra.mxu3 %v1679_v5  ;;  %v1726_v15 = vld [vmem:[%s2221_s1 + $0x40] sm:$0xff]  ;;  %v1731_v16 = vld [vmem:[%s2221_s1 + $0x48] sm:$0xff] }
   0x7   :  { %92 = vmatpush.msra.mxu1 %v19_v7  ;;  %68 = vmatpush.msra.mxu0 %v20_v13 }
   0x8   :  { %118 = vmatpush.msra.mxu2 %v1692_v8  ;;  %138 = vmatpush.msra.mxu3 %v1697_v9 }
   0x9   :  { %1397 = vmatmul.msk.f32.vlgmr.msra.gmra.mxu1 %vm47_vm0, %v40_v10 }
   0xa   :  { %9 = vsyncpa [#allocation3], 0  ;;  %119 = vmatpush.msra.mxu2 %v1707_v11  ;;  %139 = vmatpush.msra.mxu3 %v1712_v12  ;;  %v1738_v17 = vld [vmem:[%s2221_s1 + $0x30] sm:$0xff]  ;;  %v1743_v18 = vld [vmem:[%s2221_s1 + $0x38] sm:$0xff]  ;;  %v1617_v22 = vmov 0.0   ;;  %s1619_s8 = smov 96  }
   0xb   :  { %69 = vmatpush.msra.mxu0 %v18_v14  ;;  %254 = vmatpush.msrb.mxu1 %v1657_v1  ;;  %v1751_v19 = vld [vmem:[%s2221_s1 + $0x20] sm:$0xff]  ;;  %v1756_v20 = vld [vmem:[%s2221_s1 + $0x28] sm:$0xff]  ;;  %s1620_s9 = smov 32   ;;  %vm193_vm9 = vcmask 261120   ;;  %vm103_vm10 = vcmask 523264   ;;  %s1385_s13 = sshll.u32 %s2224_s4, 4  ;;  %s1386_s13 = int_to_ptr.hbm [resolvable:$true] %s1385_s13 }
   0xc   :  { %120 = vmatpush.msra.mxu2 %v1726_v15  ;;  %140 = vmatpush.msra.mxu3 %v1731_v16  ;;  %v41_v21 = vld [vmem:[%s2220_s0 + $0x8] sm:$0xff] }
   0xd   :  { %1395 = vmatmul.msk.f32.vlgmr.msra.gmra.mxu0 %vm47_vm0, %v40_v10  ;;  %255 = vmatpush.msrb.mxu1 %v1669_v3  ;;  %v1834_v23 = vld [vmem:[%s2221_s1 + $0xa0] ss:$8 sm:$0x3]  ;;  %s1618_s1 = smov 64  }
   0xe   :  { %121 = vmatpush.msra.mxu2 %v1738_v17  ;;  %141 = vmatpush.msra.mxu3 %v1743_v18  ;;  %v44_v24 = vperm.slane %v1834_v23, 1  ;;  %v43_v27 = vperm.slane %v1834_v23, 0 }
   0xf   :  { %234 = vmatpush.msrb.mxu0 %v1652_v0  ;;  %256 = vmatpush.msrb.mxu1 %v1679_v5 }
  0x10   :  { %122 = vmatpush.msra.mxu2 %v1751_v19  ;;  %142 = vmatpush.msra.mxu3 %v1756_v20 }
  0x11   :  { %123 = vmatmul.f32.vlgmr.msra.gmra.mxu2 %v1617_v22  ;;  %143 = vmatmul.f32.vlgmr.msra.gmra.mxu3 %v1617_v22 }
  0x12   :  { %1398 = vmatmul.msk.f32.gmra.mxu1 %vm47_vm0, %v41_v21  ;;  %235 = vmatpush.msrb.mxu0 %v1662_v2 }
  0x13   :  { %257 = vmatpush.msrb.mxu1 %v1697_v9  ;;  %360 = vmatpush.msrb.mxu2 %v1652_v0 }
  0x14   :  { %236 = vmatpush.msrb.mxu0 %v1674_v4  ;;  %380 = vmatpush.msrb.mxu3 %v1657_v1 }
  0x15   :  { %1396 = vmatmul.msk.f32.gmra.mxu0 %vm47_vm0, %v41_v21  ;;  %258 = vmatpush.msrb.mxu1 %v1712_v12 }
  0x16   :  { %237 = vmatpush.msrb.mxu0 %v1692_v8  ;;  %361 = vmatpush.msrb.mxu2 %v1662_v2 }
  0x17   :  { %259 = vmatpush.msrb.mxu1 %v1731_v16  ;;  %381 = vmatpush.msrb.mxu3 %v1669_v3 }
  0x18   :  { %238 = vmatpush.msrb.mxu0 %v1707_v11  ;;  %362 = vmatpush.msrb.mxu2 %v1674_v4 }
  0x19   :  { %260 = vmatpush.msrb.mxu1 %v1743_v18  ;;  %382 = vmatpush.msrb.mxu3 %v1679_v5 }
  0x1a   :  { %239 = vmatpush.msrb.mxu0 %v1726_v15  ;;  %363 = vmatpush.msrb.mxu2 %v1692_v8 }
  0x1b   :  { %261 = vmatpush.msrb.mxu1 %v1756_v20  ;;  %383 = vmatpush.msrb.mxu3 %v1697_v9 }
  0x1c   :  { %240 = vmatpush.msrb.mxu0 %v1738_v17  ;;  %364 = vmatpush.msrb.mxu2 %v1707_v11 }
  0x1d   :  { %384 = vmatpush.msrb.mxu3 %v1712_v12  ;;  %506 = vmatpush.msra.mxu1 %v1657_v1 }
  0x1e   :  { %241 = vmatpush.msrb.mxu0 %v1751_v19  ;;  %365 = vmatpush.msrb.mxu2 %v1726_v15 }
  0x1f   :  { %385 = vmatpush.msrb.mxu3 %v1731_v16  ;;  %507 = vmatpush.msra.mxu1 %v1669_v3 }
  0x20   :  { %486 = vmatpush.msra.mxu0 %v1652_v0  ;;  %366 = vmatpush.msrb.mxu2 %v1738_v17 }
  0x21   :  { %386 = vmatpush.msrb.mxu3 %v1743_v18  ;;  %508 = vmatpush.msra.mxu1 %v1679_v5 }
  0x22   :  { %487 = vmatpush.msra.mxu0 %v1662_v2  ;;  %367 = vmatpush.msrb.mxu2 %v1751_v19 }
  0x23   :  { %387 = vmatpush.msrb.mxu3 %v1756_v20  ;;  %509 = vmatpush.msra.mxu1 %v1697_v9 }
  0x24   :  { %488 = vmatpush.msra.mxu0 %v1674_v4  ;;  %615 = vmatpush.msra.mxu2 %v1652_v0 }
  0x25   :  { %635 = vmatpush.msra.mxu3 %v1657_v1  ;;  %510 = vmatpush.msra.mxu1 %v1712_v12 }
  0x26   :  { %489 = vmatpush.msra.mxu0 %v1692_v8  ;;  %616 = vmatpush.msra.mxu2 %v1662_v2 }
  0x27   :  { %636 = vmatpush.msra.mxu3 %v1669_v3  ;;  %511 = vmatpush.msra.mxu1 %v1731_v16 }
  0x28   :  { %490 = vmatpush.msra.mxu0 %v1707_v11  ;;  %617 = vmatpush.msra.mxu2 %v1674_v4 }
  0x29   :  { %637 = vmatpush.msra.mxu3 %v1679_v5  ;;  %512 = vmatpush.msra.mxu1 %v1743_v18 }
  0x2a   :  { %491 = vmatpush.msra.mxu0 %v1726_v15  ;;  %618 = vmatpush.msra.mxu2 %v1692_v8 }
  0x2b   :  { %638 = vmatpush.msra.mxu3 %v1697_v9  ;;  %513 = vmatpush.msra.mxu1 %v1756_v20 }
  0x2c   :  { %492 = vmatpush.msra.mxu0 %v1738_v17  ;;  %619 = vmatpush.msra.mxu2 %v1707_v11 }
  0x2d   :  { %639 = vmatpush.msra.mxu3 %v1712_v12 }
  0x2e   :  { %493 = vmatpush.msra.mxu0 %v1751_v19  ;;  %620 = vmatpush.msra.mxu2 %v1726_v15 }
  0x2f   :  { %640 = vmatpush.msra.mxu3 %v1731_v16 }
  0x30   :  { %621 = vmatpush.msra.mxu2 %v1738_v17 }
  0x31   :  { %641 = vmatpush.msra.mxu3 %v1743_v18 }
  0x32   :  { %622 = vmatpush.msra.mxu2 %v1751_v19 }
  0x33   :  { %642 = vmatpush.msra.mxu3 %v1756_v20 }
  0x86   :  { %v94_v25 = vpop.f32.mrf.mxu1 }
  0x87   :  { %v1837_v26 = vadd.f32 %v94_v25, %v44_v24 }
  0x8a   :  { %v71_v28 = vpop.f32.mrf.mxu0 }
  0x8b   :  { %v1844_v31 = vadd.f32 %v71_v28, %v43_v27 }
  0x8f   :  { %v97_v29 = vpop.f32.mrf.mxu1 }
  0x90   :  { %v1840_v30 = vadd.f32 %v97_v29, %v44_v24 }
  0x92   :  { %v101_v32 = vrot.slane %v1840_v30, 6 }
  0x94   :  { %v124_v33 = vpop.f32.mrf.mxu2  ;;  %v144_v34 = vpop.f32.mrf.mxu3 }
  0x95   :  { %v147_v35 = vadd.f32 %v124_v33, %v1844_v31  ;;  %v148_v36 = vadd.f32 %v144_v34, %v101_v32 }
  0x97   :  { %v1399_v37 = vmul.f32 -1.442695, %v147_v35  ;;  %1467 = vtanh.f32 %v147_v35  ;;  %v1400_v38 = vmul.f32 -1.442695, %v148_v36 }
  0x99   :  { %1469 = vpow2.f32 %v1399_v37 }
  0x9a   :  { %1471 = vpow2.f32 %v1400_v38  ;;  %v1885_v38 = vpop.f32.mrf.mxu0 }
  0x9b   :  { %1473 = vtanh.f32 %v148_v36 }
  0x9d   :  { %v1468_v39 = vpop.eup %1467 }
  0x9e   :  { %201 = vrot.lane.b32.xlu1 %v1468_v39, %s1618_s1 }
  0x9f   :  { %v1470_v40 = vpop.eup %1469 }
  0xa0   :  { %v1472_v41 = vpop.eup %1471  ;;  %v155_v42 = vadd.f32 1.0, %v1470_v40 }
  0xa1   :  { %v156_v43 = vadd.f32 1.0, %v1472_v41  ;;  %v1474_v44 = vpop.eup %1473  ;;  %v221_v41 = vrot.slane %v1840_v30, 2 }
  0xa2   :  { %1475 = vrcp.f32 %v155_v42  ;;  %vm162_vm1 = vweird.f32 %v155_v42  ;;  %v168_v51 = vand.u32 2147483648, %v155_v42  ;;  %v166_v54 = vand.u32 2147483647, %v155_v42 }
  0xa3   :  { %1477 = vrcp.f32 %v156_v43  ;;  %v183_v52 = vand.u32 2147483648, %v156_v43  ;;  %v181_v56 = vand.u32 2147483647, %v156_v43  ;;  %vm177_vm4 = vweird.f32 %v156_v43 }
  0xa4   :  { %v169_v59 = vor.u32 1.1754944e-38, %v168_v51  ;;  %vm167_vm7 = vcmp.eq.f32.partialorder %v166_v54, 8.507059e+37 }
  0xa5   :  { %v184_v60 = vor.u32 1.1754944e-38, %v183_v52  ;;  %vm182_vm8 = vcmp.eq.f32.partialorder %v181_v56, 8.507059e+37 }
  0xa6   :  { %205 = vrot.lane.b32.xlu1 %v1474_v44, %s1619_s8 }
  0xa8   :  { %v1476_v45 = vpop.eup %1475 }
  0xa9   :  { %v1478_v46 = vpop.eup %1477  ;;  %v158_v47 = vmul.f32 %v1476_v45, %v155_v42  ;;  %vm163_vm2 = vweird.f32 %v1476_v45 }
  0xaa   :  { %v173_v48 = vmul.f32 %v1478_v46, %v156_v43  ;;  %vm178_vm3 = vweird.f32 %v1478_v46  ;;  %vm164_vm5 = vmor %vm162_vm1, %vm163_vm2 }
  0xab   :  { %v159_v49 = vsub.f32 1.0, %v158_v47  ;;  %vm179_vm6 = vmor %vm177_vm4, %vm178_vm3 }
  0xac   :  { %v174_v50 = vsub.f32 1.0, %v173_v48 }
  0xad   :  { %v160_v53 = vmul.f32 %v1476_v45, %v159_v49 }
  0xae   :  { %v175_v55 = vmul.f32 %v1478_v46, %v174_v50 }
  0xaf   :  { %v161_v57 = vadd.f32 %v1476_v45, %v160_v53 }
  0xb0   :  { %v176_v58 = vadd.f32 %v1478_v46, %v175_v55 }
  0xb1   :  { %v165_v61 = vsel %vm164_vm5, %v1476_v45, %v161_v57 }
  0xb2   :  { %v180_v62 = vsel %vm179_vm6, %v1478_v46, %v176_v58  ;;  %v170_v63 = vsel %vm167_vm7, %v169_v59, %v165_v61 }
  0xb3   :  { %v185_v6 = vsel %vm182_vm8, %v184_v60, %v180_v62  ;;  %209 = vrot.lane.b32.xlu2 %v170_v63, %s1620_s9 }
  0xb4   :  { %190 = vrot.lane.b32.xlu0 %v185_v6, %s1620_s9 }
  0xbb   :  { %212 = vrot.lane.b32.xlu2 %v185_v6, %s1618_s1 }
  0xbc   :  { %196 = vrot.lane.b32.xlu0 %v170_v63, %s1619_s8 }
 0x10d   :  { %v210_v14 = vpop.permute.xlu2 %209 }
 0x110   :  { %v202_v7 = vpop.permute.xlu1 %201 }
 0x115   :  { %v213_v34 = vpop.permute.xlu2 %212 }
 0x116   :  { %v215_v36 = vsel %vm193_vm9, %v210_v14, %v213_v34 }
 0x118   :  { %v206_v13 = vpop.permute.xlu1 %205 }
 0x119   :  { %v208_v24 = vsel %vm193_vm9, %v202_v7, %v206_v13 }
 0x126   :  { %v191_v10 = vpop.permute.xlu0 %190 }
 0x127   :  { %v194_v21 = vsel %vm193_vm9, %v170_v63, %v191_v10 }
 0x128   :  { %v217_v28 = vmul.f32 %v208_v24, %v194_v21 }
 0x12e   :  { %v197_v22 = vpop.permute.xlu0 %196 }
 0x12f   :  { %v199_v25 = vsel %vm193_vm9, %v197_v22, %v185_v6 }
 0x130   :  { %v216_v29 = vmul.f32 0.0, %v199_v25 }
 0x132   :  { %v1859_v33 = vadd.f32 %v217_v28, %v216_v29 }
 0x134   :  { %1479 = vtanh.f32 %v1859_v33 }
 0x13a   :  { %v1480_v35 = vpop.eup %1479 }
 0x13b   :  { %v1863_v37 = vmul.f32 %v1480_v35, %v215_v36 }
 0x13d   :  { %1401 = vmatmul.msk.f32.vlgmr.msrb.gmra.mxu0 %vm103_vm10, %v1863_v37  ;;  %1402 = vmatmul.msk.f32.vlgmr.msrb.gmra.mxu1 %vm103_vm10, %v1863_v37 }
 0x13e   :  { %736 = vmatpush.msrb.mxu0 %v1652_v0  ;;  %756 = vmatpush.msrb.mxu1 %v1657_v1 }
 0x140   :  { %737 = vmatpush.msrb.mxu0 %v1662_v2  ;;  %757 = vmatpush.msrb.mxu1 %v1669_v3 }
 0x142   :  { %738 = vmatpush.msrb.mxu0 %v1674_v4  ;;  %758 = vmatpush.msrb.mxu1 %v1679_v5 }
 0x144   :  { %739 = vmatpush.msrb.mxu0 %v1692_v8  ;;  %759 = vmatpush.msrb.mxu1 %v1697_v9 }
 0x146   :  { %740 = vmatpush.msrb.mxu0 %v1707_v11  ;;  %760 = vmatpush.msrb.mxu1 %v1712_v12 }
 0x148   :  { %741 = vmatpush.msrb.mxu0 %v1726_v15  ;;  %761 = vmatpush.msrb.mxu1 %v1731_v16 }
 0x14a   :  { %742 = vmatpush.msrb.mxu0 %v1738_v17  ;;  %762 = vmatpush.msrb.mxu1 %v1743_v18 }
 0x14c   :  { %743 = vmatpush.msrb.mxu0 %v1751_v19  ;;  %763 = vmatpush.msrb.mxu1 %v1756_v20 }
 0x1ba   :  { %v243_v39 = vpop.f32.mrf.mxu0  ;;  %v263_v40 = vpop.f32.mrf.mxu1 }
 0x1bb   :  { %v268_v42 = vrot.slane %v243_v39, 6  ;;  %v269_v43 = vrot.slane %v263_v40, 6  ;;  %v341_v39 = vrot.slane %v1859_v33, 6 }
 0x1bd   :  { %v272_v44 = vadd.f32 %v268_v42, %v1844_v31  ;;  %v273_v45 = vadd.f32 %v269_v43, %v221_v41 }
 0x1bf   :  { %v1403_v46 = vmul.f32 -1.442695, %v272_v44  ;;  %1481 = vtanh.f32 %v272_v44  ;;  %v1404_v47 = vmul.f32 -1.442695, %v273_v45 }
 0x1c1   :  { %1483 = vpow2.f32 %v1403_v46 }
 0x1c2   :  { %1485 = vpow2.f32 %v1404_v47 }
 0x1c5   :  { %v1482_v48 = vpop.eup %1481 }
 0x1c6   :  { %325 = vrot.lane.b32.xlu2 %v1482_v48, %s1618_s1 }
 0x1c7   :  { %v1484_v49 = vpop.eup %1483 }
 0x1c8   :  { %v1486_v50 = vpop.eup %1485  ;;  %v280_v51 = vadd.f32 1.0, %v1484_v49 }
 0x1c9   :  { %v281_v52 = vadd.f32 1.0, %v1486_v50 }
 0x1ca   :  { %1487 = vrcp.f32 %v280_v51  ;;  %v293_v59 = vand.u32 2147483648, %v280_v51  ;;  %v291_v62 = vand.u32 2147483647, %v280_v51  ;;  %vm287_vm13 = vweird.f32 %v280_v51 }
 0x1cb   :  { %1489 = vrcp.f32 %v281_v52  ;;  %v308_v60 = vand.u32 2147483648, %v281_v52  ;;  %v306_v6 = vand.u32 2147483647, %v281_v52  ;;  %vm302_vm14 = vweird.f32 %v281_v52 }
 0x1cc   :  { %v294_v13 = vor.u32 1.1754944e-38, %v293_v59  ;;  %vm292_vm2 = vcmp.eq.f32.partialorder %v291_v62, 8.507059e+37  ;;  %1491 = vtanh.f32 %v273_v45 }
 0x1cd   :  { %v309_v14 = vor.u32 1.1754944e-38, %v308_v60  ;;  %vm307_vm3 = vcmp.eq.f32.partialorder %v306_v6, 8.507059e+37 }
 0x1d0   :  { %v1488_v53 = vpop.eup %1487 }
 0x1d1   :  { %v1490_v54 = vpop.eup %1489  ;;  %v283_v55 = vmul.f32 %v1488_v53, %v280_v51  ;;  %vm288_vm11 = vweird.f32 %v1488_v53 }
 0x1d2   :  { %v298_v56 = vmul.f32 %v1490_v54, %v281_v52  ;;  %vm303_vm12 = vweird.f32 %v1490_v54  ;;  %vm289_vm15 = vmor %vm287_vm13, %vm288_vm11  ;;  %v1492_v28 = vpop.eup %1491 }
 0x1d3   :  { %v284_v57 = vsub.f32 1.0, %v283_v55  ;;  %vm304_vm1 = vmor %vm302_vm14, %vm303_vm12 }
 0x1d4   :  { %v299_v58 = vsub.f32 1.0, %v298_v56 }
 0x1d5   :  { %v285_v61 = vmul.f32 %v1488_v53, %v284_v57 }
 0x1d6   :  { %v300_v63 = vmul.f32 %v1490_v54, %v299_v58 }
 0x1d7   :  { %v286_v7 = vadd.f32 %v1488_v53, %v285_v61 }
 0x1d8   :  { %v301_v10 = vadd.f32 %v1490_v54, %v300_v63 }
 0x1d9   :  { %v290_v21 = vsel %vm289_vm15, %v1488_v53, %v286_v7 }
 0x1da   :  { %v305_v22 = vsel %vm304_vm1, %v1490_v54, %v301_v10  ;;  %v295_v24 = vsel %vm292_vm2, %v294_v13, %v290_v21 }
 0x1db   :  { %v310_v25 = vsel %vm307_vm3, %v309_v14, %v305_v22  ;;  %320 = vrot.lane.b32.xlu1 %v295_v24, %s1619_s8 }
 0x1dc   :  { %315 = vrot.lane.b32.xlu0 %v310_v25, %s1620_s9  ;;  %336 = vrot.lane.b32.xlu2 %v310_v25, %s1618_s1 }
 0x1e3   :  { %333 = vrot.lane.b32.xlu1 %v295_v24, %s1620_s9 }
 0x1e4   :  { %329 = vrot.lane.b32.xlu0 %v1492_v28, %s1619_s8 }
 0x220   :  { %v326_v36 = vpop.permute.xlu2 %325 }
 0x236   :  { %v337_v48 = vpop.permute.xlu2 %336 }
 0x24d   :  { %v321_v34 = vpop.permute.xlu1 %320 }
 0x24e   :  { %v316_v29 = vpop.permute.xlu0 %315  ;;  %v323_v35 = vsel %vm193_vm9, %v321_v34, %v310_v25 }
 0x24f   :  { %v318_v42 = vsel %vm193_vm9, %v295_v24, %v316_v29  ;;  %v343_v44 = vmul.f32 %v341_v39, %v323_v35 }
 0x255   :  { %v334_v47 = vpop.permute.xlu1 %333 }
 0x256   :  { %v330_v40 = vpop.permute.xlu0 %329  ;;  %v339_v50 = vsel %vm193_vm9, %v334_v47, %v337_v48 }
 0x257   :  { %v332_v43 = vsel %vm193_vm9, %v326_v36, %v330_v40 }
 0x258   :  { %v344_v46 = vmul.f32 %v332_v43, %v318_v42 }
 0x25a   :  { %v1901_v45 = vadd.f32 %v344_v46, %v343_v44 }
 0x25c   :  { %1493 = vtanh.f32 %v1901_v45 }
 0x262   :  { %v1494_v49 = vpop.eup %1493 }
 0x263   :  { %v1905_v51 = vmul.f32 %v1494_v49, %v339_v50 }
 0x265   :  { %v349_v33 = vrot.slane %v1905_v51, 2 }
 0x267   :  { %1405 = vmatmul.msk.f32.vlgmr.msrb.gmra.mxu2 %vm103_vm10, %v349_v33  ;;  %1406 = vmatmul.msk.f32.vlgmr.msrb.gmra.mxu3 %vm103_vm10, %v349_v33 }
 0x268   :  { %862 = vmatpush.msrb.mxu2 %v1652_v0  ;;  %882 = vmatpush.msrb.mxu3 %v1657_v1 }
 0x26a   :  { %863 = vmatpush.msrb.mxu2 %v1662_v2  ;;  %883 = vmatpush.msrb.mxu3 %v1669_v3 }
 0x26c   :  { %864 = vmatpush.msrb.mxu2 %v1674_v4  ;;  %884 = vmatpush.msrb.mxu3 %v1679_v5 }
 0x26e   :  { %865 = vmatpush.msrb.mxu2 %v1692_v8  ;;  %885 = vmatpush.msrb.mxu3 %v1697_v9 }
 0x270   :  { %866 = vmatpush.msrb.mxu2 %v1707_v11  ;;  %886 = vmatpush.msrb.mxu3 %v1712_v12 }
 0x272   :  { %867 = vmatpush.msrb.mxu2 %v1726_v15  ;;  %887 = vmatpush.msrb.mxu3 %v1731_v16 }
 0x274   :  { %868 = vmatpush.msrb.mxu2 %v1738_v17  ;;  %888 = vmatpush.msrb.mxu3 %v1743_v18 }
 0x276   :  { %869 = vmatpush.msrb.mxu2 %v1751_v19  ;;  %889 = vmatpush.msrb.mxu3 %v1756_v20 }
 0x2ea   :  { %v369_v52 = vpop.f32.mrf.mxu2  ;;  %v389_v53 = vpop.f32.mrf.mxu3 }
 0x2eb   :  { %v394_v54 = vrot.slane %v369_v52, 4  ;;  %v395_v55 = vrot.slane %v389_v53, 4  ;;  %v467_v52 = vrot.slane %v1901_v45, 6 }
 0x2ed   :  { %v398_v56 = vadd.f32 %v394_v54, %v1844_v31  ;;  %v399_v57 = vadd.f32 %v395_v55, %v101_v32 }
 0x2ef   :  { %v1407_v58 = vmul.f32 -1.442695, %v398_v56  ;;  %1495 = vtanh.f32 %v398_v56  ;;  %v1408_v59 = vmul.f32 -1.442695, %v399_v57 }
 0x2f1   :  { %1497 = vpow2.f32 %v1407_v58 }
 0x2f2   :  { %1499 = vpow2.f32 %v1408_v59 }
 0x2f5   :  { %v1496_v60 = vpop.eup %1495 }
 0x2f6   :  { %451 = vrot.lane.b32.xlu2 %v1496_v60, %s1618_s1 }
 0x2f7   :  { %v1498_v61 = vpop.eup %1497 }
 0x2f8   :  { %v1500_v62 = vpop.eup %1499  ;;  %v406_v63 = vadd.f32 1.0, %v1498_v61 }
 0x2f9   :  { %v407_v6 = vadd.f32 1.0, %v1500_v62 }
 0x2fa   :  { %1501 = vrcp.f32 %v406_v63  ;;  %v419_v22 = vand.u32 2147483648, %v406_v63  ;;  %v417_v28 = vand.u32 2147483647, %v406_v63  ;;  %vm413_vm6 = vweird.f32 %v406_v63 }
 0x2fb   :  { %1503 = vrcp.f32 %v407_v6  ;;  %v434_v24 = vand.u32 2147483648, %v407_v6  ;;  %v432_v34 = vand.u32 2147483647, %v407_v6  ;;  %vm428_vm7 = vweird.f32 %v407_v6 }
 0x2fc   :  { %v420_v39 = vor.u32 1.1754944e-38, %v419_v22  ;;  %vm418_vm12 = vcmp.eq.f32.partialorder %v417_v28, 8.507059e+37  ;;  %1505 = vtanh.f32 %v399_v57 }
 0x2fd   :  { %v435_v40 = vor.u32 1.1754944e-38, %v434_v24  ;;  %vm433_vm13 = vcmp.eq.f32.partialorder %v432_v34, 8.507059e+37 }
 0x300   :  { %v1502_v7 = vpop.eup %1501 }
 0x301   :  { %v1504_v10 = vpop.eup %1503  ;;  %v409_v13 = vmul.f32 %v1502_v7, %v406_v63  ;;  %vm414_vm4 = vweird.f32 %v1502_v7 }
 0x302   :  { %v424_v14 = vmul.f32 %v1504_v10, %v407_v6  ;;  %vm429_vm5 = vweird.f32 %v1504_v10  ;;  %vm415_vm8 = vmor %vm413_vm6, %vm414_vm4  ;;  %v1506_v47 = vpop.eup %1505 }
 0x303   :  { %v410_v21 = vsub.f32 1.0, %v409_v13  ;;  %vm430_vm11 = vmor %vm428_vm7, %vm429_vm5 }
 0x304   :  { %v425_v32 = vsub.f32 1.0, %v424_v14 }
 0x305   :  { %v411_v25 = vmul.f32 %v1502_v7, %v410_v21 }
 0x306   :  { %v426_v29 = vmul.f32 %v1504_v10, %v425_v32 }
 0x307   :  { %v412_v35 = vadd.f32 %v1502_v7, %v411_v25 }
 0x308   :  { %v427_v36 = vadd.f32 %v1504_v10, %v426_v29 }
 0x309   :  { %v416_v42 = vsel %vm415_vm8, %v1502_v7, %v412_v35 }
 0x30a   :  { %v431_v43 = vsel %vm430_vm11, %v1504_v10, %v427_v36  ;;  %v421_v44 = vsel %vm418_vm12, %v420_v39, %v416_v42 }
 0x30b   :  { %v436_v46 = vsel %vm433_vm13, %v435_v40, %v431_v43  ;;  %446 = vrot.lane.b32.xlu1 %v421_v44, %s1619_s8 }
 0x30c   :  { %441 = vrot.lane.b32.xlu0 %v436_v46, %s1620_s9  ;;  %462 = vrot.lane.b32.xlu2 %v436_v46, %s1618_s1 }
 0x313   :  { %459 = vrot.lane.b32.xlu1 %v421_v44, %s1620_s9 }
 0x314   :  { %455 = vrot.lane.b32.xlu0 %v1506_v47, %s1619_s8 }
 0x350   :  { %v452_v33 = vpop.permute.xlu2 %451 }
 0x366   :  { %v463_v60 = vpop.permute.xlu2 %462 }
 0x37d   :  { %v447_v49 = vpop.permute.xlu1 %446 }
 0x37e   :  { %v442_v48 = vpop.permute.xlu0 %441  ;;  %v449_v50 = vsel %vm193_vm9, %v447_v49, %v436_v46 }
 0x37f   :  { %v444_v54 = vsel %vm193_vm9, %v421_v44, %v442_v48  ;;  %v469_v56 = vmul.f32 %v467_v52, %v449_v50 }
 0x385   :  { %v460_v59 = vpop.permute.xlu1 %459 }
 0x386   :  { %v456_v53 = vpop.permute.xlu0 %455  ;;  %v465_v62 = vsel %vm193_vm9, %v460_v59, %v463_v60  ;;  %v601_v59 = vrot.slane %v1837_v26, 6 }
 0x387   :  { %v458_v55 = vsel %vm193_vm9, %v452_v33, %v456_v53 }
 0x388   :  { %v470_v58 = vmul.f32 %v458_v55, %v444_v54 }
 0x38a   :  { %v1939_v57 = vadd.f32 %v470_v58, %v469_v56 }
 0x38c   :  { %1507 = vtanh.f32 %v1939_v57  ;;  %v593_v44 = vrot.slane %v1939_v57, 6  ;;  %v1993_v57 = vadd.f32 %v1885_v38, %v43_v27 }
 0x392   :  { %v1508_v61 = vpop.eup %1507 }
 0x393   :  { %v1943_v63 = vmul.f32 %v1508_v61, %v465_v62 }
 0x395   :  { %v475_v45 = vrot.slane %v1943_v63, 4 }
 0x397   :  { %1409 = vmatmul.msk.f32.vlgmr.msra.gmra.mxu0 %vm103_vm10, %v475_v45  ;;  %1410 = vmatmul.msk.f32.vlgmr.msra.gmra.mxu1 %vm103_vm10, %v475_v45 }
 0x398   :  { %988 = vmatpush.msra.mxu0 %v1652_v0  ;;  %1008 = vmatpush.msra.mxu1 %v1657_v1 }
 0x39a   :  { %989 = vmatpush.msra.mxu0 %v1662_v2  ;;  %1009 = vmatpush.msra.mxu1 %v1669_v3 }
 0x39c   :  { %990 = vmatpush.msra.mxu0 %v1674_v4  ;;  %1010 = vmatpush.msra.mxu1 %v1679_v5 }
 0x39e   :  { %991 = vmatpush.msra.mxu0 %v1692_v8  ;;  %1011 = vmatpush.msra.mxu1 %v1697_v9 }
 0x3a0   :  { %992 = vmatpush.msra.mxu0 %v1707_v11  ;;  %1012 = vmatpush.msra.mxu1 %v1712_v12 }
 0x3a2   :  { %993 = vmatpush.msra.mxu0 %v1726_v15  ;;  %1013 = vmatpush.msra.mxu1 %v1731_v16 }
 0x3a4   :  { %994 = vmatpush.msra.mxu0 %v1738_v17  ;;  %1014 = vmatpush.msra.mxu1 %v1743_v18 }
 0x3a6   :  { %995 = vmatpush.msra.mxu0 %v1751_v19  ;;  %1015 = vmatpush.msra.mxu1 %v1756_v20 }
 0x414   :  { %v495_v0 = vpop.f32.mrf.mxu0  ;;  %v515_v1 = vpop.f32.mrf.mxu1 }
 0x415   :  { %v520_v2 = vrot.slane %v495_v0, 2  ;;  %v521_v3 = vrot.slane %v515_v1, 2 }
 0x417   :  { %v524_v4 = vadd.f32 %v520_v2, %v1844_v31  ;;  %v525_v5 = vadd.f32 %v521_v3, %v221_v41 }
 0x419   :  { %v1411_v8 = vmul.f32 -1.442695, %v524_v4  ;;  %1509 = vtanh.f32 %v524_v4  ;;  %v1412_v9 = vmul.f32 -1.442695, %v525_v5 }
 0x41b   :  { %1511 = vpow2.f32 %v1411_v8 }
 0x41c   :  { %1513 = vpow2.f32 %v1412_v9 }
 0x41f   :  { %v1510_v11 = vpop.eup %1509 }
 0x420   :  { %577 = vrot.lane.b32.xlu2 %v1510_v11, %s1618_s1 }
 0x421   :  { %v1512_v12 = vpop.eup %1511 }
 0x422   :  { %v1514_v15 = vpop.eup %1513  ;;  %v532_v16 = vadd.f32 1.0, %v1512_v12 }
 0x423   :  { %v533_v17 = vadd.f32 1.0, %v1514_v15 }
 0x424   :  { %1515 = vrcp.f32 %v532_v16  ;;  %v545_v6 = vand.u32 2147483648, %v532_v16  ;;  %v543_v13 = vand.u32 2147483647, %v532_v16  ;;  %vm539_vm1 = vweird.f32 %v532_v16 }
 0x425   :  { %1517 = vrcp.f32 %v533_v17  ;;  %v560_v7 = vand.u32 2147483648, %v533_v17  ;;  %v558_v21 = vand.u32 2147483647, %v533_v17  ;;  %vm554_vm2 = vweird.f32 %v533_v17 }
 0x426   :  { %v546_v24 = vor.u32 1.1754944e-38, %v545_v6  ;;  %vm544_vm5 = vcmp.eq.f32.partialorder %v543_v13, 8.507059e+37  ;;  %1519 = vtanh.f32 %v525_v5 }
 0x427   :  { %v561_v25 = vor.u32 1.1754944e-38, %v560_v7  ;;  %vm559_vm6 = vcmp.eq.f32.partialorder %v558_v21, 8.507059e+37 }
 0x42a   :  { %v1516_v18 = vpop.eup %1515 }
 0x42b   :  { %v1518_v19 = vpop.eup %1517  ;;  %v535_v20 = vmul.f32 %v1516_v18, %v532_v16  ;;  %vm540_vm14 = vweird.f32 %v1516_v18 }
 0x42c   :  { %v550_v31 = vmul.f32 %v1518_v19, %v533_v17  ;;  %vm555_vm15 = vweird.f32 %v1518_v19  ;;  %vm541_vm3 = vmor %vm539_vm1, %vm540_vm14  ;;  %v1520_v36 = vpop.eup %1519 }
 0x42d   :  { %v536_v30 = vsub.f32 1.0, %v535_v20  ;;  %vm556_vm4 = vmor %vm554_vm2, %vm555_vm15 }
 0x42e   :  { %v551_v41 = vsub.f32 1.0, %v550_v31 }
 0x42f   :  { %v537_v10 = vmul.f32 %v1516_v18, %v536_v30 }
 0x430   :  { %v552_v14 = vmul.f32 %v1518_v19, %v551_v41 }
 0x431   :  { %v538_v32 = vadd.f32 %v1516_v18, %v537_v10 }
 0x432   :  { %v553_v22 = vadd.f32 %v1518_v19, %v552_v14 }
 0x433   :  { %v542_v28 = vsel %vm541_vm3, %v1516_v18, %v538_v32 }
 0x434   :  { %v557_v29 = vsel %vm556_vm4, %v1518_v19, %v553_v22  ;;  %v547_v34 = vsel %vm544_vm5, %v546_v24, %v542_v28 }
 0x435   :  { %v562_v35 = vsel %vm559_vm6, %v561_v25, %v557_v29  ;;  %572 = vrot.lane.b32.xlu1 %v547_v34, %s1619_s8 }
 0x436   :  { %567 = vrot.lane.b32.xlu0 %v562_v35, %s1620_s9  ;;  %588 = vrot.lane.b32.xlu2 %v562_v35, %s1618_s1 }
 0x43d   :  { %585 = vrot.lane.b32.xlu1 %v547_v34, %s1620_s9 }
 0x43e   :  { %581 = vrot.lane.b32.xlu0 %v1520_v36, %s1619_s8 }
 0x47a   :  { %v578_v43 = vpop.permute.xlu2 %577 }
 0x490   :  { %v589_v53 = vpop.permute.xlu2 %588 }
 0x4a7   :  { %v573_v40 = vpop.permute.xlu1 %572 }
 0x4a8   :  { %v568_v39 = vpop.permute.xlu0 %567  ;;  %v575_v42 = vsel %vm193_vm9, %v573_v40, %v562_v35 }
 0x4a9   :  { %v570_v47 = vsel %vm193_vm9, %v547_v34, %v568_v39  ;;  %v595_v49 = vmul.f32 %v593_v44, %v575_v42 }
 0x4af   :  { %v586_v52 = vpop.permute.xlu1 %585 }
 0x4b0   :  { %v582_v46 = vpop.permute.xlu0 %581  ;;  %v591_v55 = vsel %vm193_vm9, %v586_v52, %v589_v53 }
 0x4b1   :  { %v584_v48 = vsel %vm193_vm9, %v578_v43, %v582_v46 }
 0x4b2   :  { %v596_v50 = vmul.f32 %v584_v48, %v570_v47 }
 0x4b4   :  { %v1977_v33 = vadd.f32 %v596_v50, %v595_v49  ;;  %v723_v50 = vrot.slane %v1837_v26, 2 }
 0x4b6   :  { %1521 = vtanh.f32 %v1977_v33  ;;  %v716_v28 = vrot.slane %v1977_v33, 6 }
 0x4bc   :  { %v1522_v54 = vpop.eup %1521 }
 0x4bd   :  { %v1981_v56 = vmul.f32 %v1522_v54, %v591_v55 }
 0x4bf   :  { %v1984_v58 = vrot.slane %v1981_v56, 6 }
 0x4c1   :  { %1413 = vmatmul.msk.f32.vlgmr.msra.gmra.mxu2 %vm103_vm10, %v1984_v58  ;;  %1414 = vmatmul.msk.f32.vlgmr.msra.gmra.mxu3 %vm103_vm10, %v1984_v58 }
 0x544   :  { %v624_v60 = vpop.f32.mrf.mxu2  ;;  %v644_v61 = vpop.f32.mrf.mxu3 }
 0x545   :  { %v647_v62 = vadd.f32 %v624_v60, %v1993_v57  ;;  %v648_v45 = vadd.f32 %v644_v61, %v601_v59 }
 0x547   :  { %v1415_v0 = vmul.f32 -1.442695, %v647_v62  ;;  %1523 = vtanh.f32 %v647_v62  ;;  %v1416_v1 = vmul.f32 -1.442695, %v648_v45 }
 0x549   :  { %1525 = vpow2.f32 %v1415_v0 }
 0x54a   :  { %1527 = vpow2.f32 %v1416_v1 }
 0x54d   :  { %v1524_v2 = vpop.eup %1523 }
 0x54e   :  { %700 = vrot.lane.b32.xlu2 %v1524_v2, %s1618_s1 }
 0x54f   :  { %v1526_v23 = vpop.eup %1525 }
 0x550   :  { %v1528_v27 = vpop.eup %1527  ;;  %v655_v38 = vadd.f32 1.0, %v1526_v23 }
 0x551   :  { %v656_v3 = vadd.f32 1.0, %v1528_v27 }
 0x552   :  { %1529 = vrcp.f32 %v655_v38  ;;  %v668_v15 = vand.u32 2147483648, %v655_v38  ;;  %v666_v18 = vand.u32 2147483647, %v655_v38  ;;  %vm662_vm11 = vweird.f32 %v655_v38 }
 0x553   :  { %1531 = vrcp.f32 %v656_v3  ;;  %v683_v16 = vand.u32 2147483648, %v656_v3  ;;  %v681_v20 = vand.u32 2147483647, %v656_v3  ;;  %vm677_vm12 = vweird.f32 %v656_v3 }
 0x554   :  { %v669_v41 = vor.u32 1.1754944e-38, %v668_v15  ;;  %vm667_vm15 = vcmp.eq.f32.partialorder %v666_v18, 8.507059e+37  ;;  %1533 = vtanh.f32 %v648_v45 }
 0x555   :  { %v684_v6 = vor.u32 1.1754944e-38, %v683_v16  ;;  %vm682_vm1 = vcmp.eq.f32.partialorder %v681_v20, 8.507059e+37 }
 0x558   :  { %v1530_v4 = vpop.eup %1529 }
 0x559   :  { %v1532_v5 = vpop.eup %1531  ;;  %v658_v8 = vmul.f32 %v1530_v4, %v655_v38  ;;  %vm663_vm7 = vweird.f32 %v1530_v4 }
 0x55a   :  { %v673_v9 = vmul.f32 %v1532_v5, %v656_v3  ;;  %vm678_vm8 = vweird.f32 %v1532_v5  ;;  %vm664_vm13 = vmor %vm662_vm11, %vm663_vm7  ;;  %v1534_v21 = vpop.eup %1533 }
 0x55b   :  { %v659_v11 = vsub.f32 1.0, %v658_v8  ;;  %vm679_vm14 = vmor %vm677_vm12, %vm678_vm8  ;;  %vm1126_vm12 = vcmask 1041408  }
 0x55c   :  { %v674_v12 = vsub.f32 1.0, %v673_v9 }
 0x55d   :  { %v660_v17 = vmul.f32 %v1530_v4, %v659_v11 }
 0x55e   :  { %v675_v19 = vmul.f32 %v1532_v5, %v674_v12 }
 0x55f   :  { %v661_v31 = vadd.f32 %v1530_v4, %v660_v17 }
 0x560   :  { %v676_v30 = vadd.f32 %v1532_v5, %v675_v19 }
 0x561   :  { %v665_v7 = vsel %vm664_vm13, %v1530_v4, %v661_v31 }
 0x562   :  { %v680_v10 = vsel %vm679_vm14, %v1532_v5, %v676_v30  ;;  %v670_v13 = vsel %vm667_vm15, %v669_v41, %v665_v7 }
 0x563   :  { %v685_v14 = vsel %vm682_vm1, %v684_v6, %v680_v10  ;;  %695 = vrot.lane.b32.xlu1 %v670_v13, %s1619_s8 }
 0x564   :  { %690 = vrot.lane.b32.xlu0 %v685_v14, %s1620_s9  ;;  %711 = vrot.lane.b32.xlu2 %v685_v14, %s1618_s1 }
 0x56b   :  { %708 = vrot.lane.b32.xlu1 %v670_v13, %s1620_s9 }
 0x56c   :  { %704 = vrot.lane.b32.xlu0 %v1534_v21, %s1619_s8 }
 0x5a8   :  { %v701_v25 = vpop.permute.xlu2 %700 }
 0x5be   :  { %v712_v43 = vpop.permute.xlu2 %711 }
 0x5d5   :  { %v696_v22 = vpop.permute.xlu1 %695 }
 0x5d6   :  { %v691_v32 = vpop.permute.xlu0 %690  ;;  %v698_v24 = vsel %vm193_vm9, %v696_v22, %v685_v14 }
 0x5d7   :  { %v693_v34 = vsel %vm193_vm9, %v670_v13, %v691_v32  ;;  %v718_v36 = vmul.f32 %v716_v28, %v698_v24 }
 0x5dd   :  { %v709_v42 = vpop.permute.xlu1 %708 }
 0x5de   :  { %v705_v29 = vpop.permute.xlu0 %704  ;;  %v714_v46 = vsel %vm193_vm9, %v709_v42, %v712_v43  ;;  %v1117_v42 = vrot.slane %v1943_v63, 2 }
 0x5df   :  { %v707_v35 = vsel %vm193_vm9, %v701_v25, %v705_v29 }
 0x5e0   :  { %v719_v39 = vmul.f32 %v707_v35, %v693_v34 }
 0x5e2   :  { %v2009_v40 = vadd.f32 %v719_v39, %v718_v36 }
 0x5e4   :  { %1535 = vtanh.f32 %v2009_v40  ;;  %v843_v21 = vrot.slane %v2009_v40, 6 }
 0x5ea   :  { %v1536_v44 = vpop.eup %1535 }
 0x5eb   :  { %v2013_v47 = vmul.f32 %v1536_v44, %v714_v46 }
 0x5ed   :  { %1417 = vmatmul.msk.f32.vlgmr.msrb.gmra.mxu0 %vm103_vm10, %v2013_v47  ;;  %1418 = vmatmul.msk.f32.vlgmr.msrb.gmra.mxu1 %vm103_vm10, %v2013_v47  ;;  %v1116_v46 = vsel %vm193_vm9, %v2013_v47, %v1984_v58 }
 0x66a   :  { %v745_v48 = vpop.f32.mrf.mxu0  ;;  %v765_v49 = vpop.f32.mrf.mxu1 }
 0x66b   :  { %v770_v33 = vrot.slane %v745_v48, 6  ;;  %v771_v52 = vrot.slane %v765_v49, 6 }
 0x66d   :  { %v774_v53 = vadd.f32 %v770_v33, %v1993_v57  ;;  %v775_v54 = vadd.f32 %v771_v52, %v723_v50 }
 0x66f   :  { %v1419_v55 = vmul.f32 -1.442695, %v774_v53  ;;  %1537 = vtanh.f32 %v774_v53  ;;  %v1420_v60 = vmul.f32 -1.442695, %v775_v54 }
 0x671   :  { %1539 = vpow2.f32 %v1419_v55 }
 0x672   :  { %1541 = vpow2.f32 %v1420_v60 }
 0x675   :  { %v1538_v61 = vpop.eup %1537 }
 0x676   :  { %827 = vrot.lane.b32.xlu2 %v1538_v61, %s1618_s1 }
 0x677   :  { %v1540_v62 = vpop.eup %1539 }
 0x678   :  { %v1542_v45 = vpop.eup %1541  ;;  %v782_v0 = vadd.f32 1.0, %v1540_v62 }
 0x679   :  { %v783_v1 = vadd.f32 1.0, %v1542_v45 }
 0x67a   :  { %1543 = vrcp.f32 %v782_v0  ;;  %v795_v5 = vand.u32 2147483648, %v782_v0  ;;  %v793_v11 = vand.u32 2147483647, %v782_v0  ;;  %vm789_vm4 = vweird.f32 %v782_v0 }
 0x67b   :  { %1545 = vrcp.f32 %v783_v1  ;;  %v810_v8 = vand.u32 2147483648, %v783_v1  ;;  %v808_v15 = vand.u32 2147483647, %v783_v1  ;;  %vm804_vm5 = vweird.f32 %v783_v1 }
 0x67c   :  { %v796_v18 = vor.u32 1.1754944e-38, %v795_v5  ;;  %vm794_vm8 = vcmp.eq.f32.partialorder %v793_v11, 8.507059e+37  ;;  %1547 = vtanh.f32 %v775_v54 }
 0x67d   :  { %v811_v19 = vor.u32 1.1754944e-38, %v810_v8  ;;  %vm809_vm11 = vcmp.eq.f32.partialorder %v808_v15, 8.507059e+37 }
 0x680   :  { %v1544_v2 = vpop.eup %1543 }
 0x681   :  { %v1546_v23 = vpop.eup %1545  ;;  %v785_v27 = vmul.f32 %v1544_v2, %v782_v0  ;;  %vm790_vm2 = vweird.f32 %v1544_v2 }
 0x682   :  { %v800_v38 = vmul.f32 %v1546_v23, %v783_v1  ;;  %vm805_vm3 = vweird.f32 %v1546_v23  ;;  %vm791_vm6 = vmor %vm789_vm4, %vm790_vm2  ;;  %v1548_v6 = vpop.eup %1547 }
 0x683   :  { %v786_v3 = vsub.f32 1.0, %v785_v27  ;;  %vm806_vm7 = vmor %vm804_vm5, %vm805_vm3 }
 0x684   :  { %v801_v4 = vsub.f32 1.0, %v800_v38 }
 0x685   :  { %v787_v9 = vmul.f32 %v1544_v2, %v786_v3 }
 0x686   :  { %v802_v12 = vmul.f32 %v1546_v23, %v801_v4 }
 0x687   :  { %v788_v16 = vadd.f32 %v1544_v2, %v787_v9 }
 0x688   :  { %v803_v17 = vadd.f32 %v1546_v23, %v802_v12 }
 0x689   :  { %v792_v20 = vsel %vm791_vm6, %v1544_v2, %v788_v16  ;;  %vm1128_vm6 = vcmask 1043456  }
 0x68a   :  { %v807_v31 = vsel %vm806_vm7, %v1546_v23, %v803_v17  ;;  %v797_v30 = vsel %vm794_vm8, %v796_v18, %v792_v20 }
 0x68b   :  { %v812_v41 = vsel %vm809_vm11, %v811_v19, %v807_v31  ;;  %822 = vrot.lane.b32.xlu1 %v797_v30, %s1619_s8 }
 0x68c   :  { %817 = vrot.lane.b32.xlu0 %v812_v41, %s1620_s9  ;;  %838 = vrot.lane.b32.xlu2 %v812_v41, %s1618_s1 }
 0x693   :  { %835 = vrot.lane.b32.xlu1 %v797_v30, %s1620_s9 }
 0x694   :  { %831 = vrot.lane.b32.xlu0 %v1548_v6, %s1619_s8 }
 0x6d0   :  { %v828_v14 = vpop.permute.xlu2 %827 }
 0x6e6   :  { %v839_v35 = vpop.permute.xlu2 %838 }
 0x6fd   :  { %v823_v10 = vpop.permute.xlu1 %822 }
 0x6fe   :  { %v818_v7 = vpop.permute.xlu0 %817  ;;  %v825_v13 = vsel %vm193_vm9, %v823_v10, %v812_v41 }
 0x6ff   :  { %v820_v22 = vsel %vm193_vm9, %v797_v30, %v818_v7  ;;  %v845_v25 = vmul.f32 %v843_v21, %v825_v13 }
 0x705   :  { %v836_v34 = vpop.permute.xlu1 %835 }
 0x706   :  { %v832_v32 = vpop.permute.xlu0 %831  ;;  %v841_v39 = vsel %vm193_vm9, %v836_v34, %v839_v35 }
 0x707   :  { %v834_v24 = vsel %vm193_vm9, %v828_v14, %v832_v32 }
 0x708   :  { %v846_v28 = vmul.f32 %v834_v24, %v820_v22 }
 0x70a   :  { %v2033_v29 = vadd.f32 %v846_v28, %v845_v25 }
 0x70c   :  { %1549 = vtanh.f32 %v2033_v29  ;;  %v969_v14 = vrot.slane %v2033_v29, 6 }
 0x712   :  { %v1550_v36 = vpop.eup %1549 }
 0x713   :  { %v2038_v43 = vmul.f32 %v1550_v36, %v841_v39 }
 0x715   :  { %v851_v40 = vrot.slane %v2038_v43, 2  ;;  %v1119_v44 = vsel %vm193_vm9, %v2038_v43, %v1117_v42  ;;  %v1120_v42 = vrot.slane %v1905_v51, 6 }
 0x716   :  { %v2047_v48 = vsel %vm1126_vm12, %v1116_v46, %v1119_v44 }
 0x717   :  { %1421 = vmatmul.msk.f32.vlgmr.msrb.gmra.mxu2 %vm103_vm10, %v851_v40  ;;  %1422 = vmatmul.msk.f32.vlgmr.msrb.gmra.mxu3 %vm103_vm10, %v851_v40 }
 0x79a   :  { %v871_v49 = vpop.f32.mrf.mxu2  ;;  %v891_v33 = vpop.f32.mrf.mxu3 }
 0x79b   :  { %v896_v52 = vrot.slane %v871_v49, 4  ;;  %v897_v53 = vrot.slane %v891_v33, 4 }
 0x79d   :  { %v900_v54 = vadd.f32 %v896_v52, %v1993_v57  ;;  %v901_v55 = vadd.f32 %v897_v53, %v601_v59 }
 0x79f   :  { %v1423_v60 = vmul.f32 -1.442695, %v900_v54  ;;  %1551 = vtanh.f32 %v900_v54  ;;  %v1424_v61 = vmul.f32 -1.442695, %v901_v55 }
 0x7a1   :  { %1553 = vpow2.f32 %v1423_v60 }
 0x7a2   :  { %1555 = vpow2.f32 %v1424_v61 }
 0x7a5   :  { %v1552_v58 = vpop.eup %1551 }
 0x7a6   :  { %953 = vrot.lane.b32.xlu2 %v1552_v58, %s1618_s1 }
 0x7a7   :  { %v1554_v62 = vpop.eup %1553 }
 0x7a8   :  { %v1556_v45 = vpop.eup %1555  ;;  %v908_v0 = vadd.f32 1.0, %v1554_v62 }
 0x7a9   :  { %v909_v1 = vadd.f32 1.0, %v1556_v45 }
 0x7aa   :  { %1557 = vrcp.f32 %v908_v0  ;;  %v921_v4 = vand.u32 2147483648, %v908_v0  ;;  %v919_v9 = vand.u32 2147483647, %v908_v0  ;;  %vm915_vm15 = vweird.f32 %v908_v0 }
 0x7ab   :  { %1559 = vrcp.f32 %v909_v1  ;;  %v936_v5 = vand.u32 2147483648, %v909_v1  ;;  %v934_v12 = vand.u32 2147483647, %v909_v1  ;;  %vm930_vm1 = vweird.f32 %v909_v1 }
 0x7ac   :  { %v922_v17 = vor.u32 1.1754944e-38, %v921_v4  ;;  %vm920_vm4 = vcmp.eq.f32.partialorder %v919_v9, 8.507059e+37  ;;  %1561 = vtanh.f32 %v901_v55 }
 0x7ad   :  { %v937_v18 = vor.u32 1.1754944e-38, %v936_v5  ;;  %vm935_vm5 = vcmp.eq.f32.partialorder %v934_v12, 8.507059e+37 }
 0x7b0   :  { %v1558_v2 = vpop.eup %1557 }
 0x7b1   :  { %v1560_v23 = vpop.eup %1559  ;;  %v911_v27 = vmul.f32 %v1558_v2, %v908_v0  ;;  %vm916_vm13 = vweird.f32 %v1558_v2 }
 0x7b2   :  { %v926_v38 = vmul.f32 %v1560_v23, %v909_v1  ;;  %vm931_vm14 = vweird.f32 %v1560_v23  ;;  %vm917_vm2 = vmor %vm915_vm15, %vm916_vm13  ;;  %v1562_v41 = vpop.eup %1561 }
 0x7b3   :  { %v912_v3 = vsub.f32 1.0, %v911_v27  ;;  %vm932_vm3 = vmor %vm930_vm1, %vm931_vm14 }
 0x7b4   :  { %v927_v59 = vsub.f32 1.0, %v926_v38 }
 0x7b5   :  { %v913_v8 = vmul.f32 %v1558_v2, %v912_v3 }
 0x7b6   :  { %v928_v11 = vmul.f32 %v1560_v23, %v927_v59 }
 0x7b7   :  { %v914_v15 = vadd.f32 %v1558_v2, %v913_v8 }
 0x7b8   :  { %v929_v16 = vadd.f32 %v1560_v23, %v928_v11 }
 0x7b9   :  { %v918_v19 = vsel %vm917_vm2, %v1558_v2, %v914_v15 }
 0x7ba   :  { %v933_v20 = vsel %vm932_vm3, %v1560_v23, %v929_v16  ;;  %v923_v31 = vsel %vm920_vm4, %v922_v17, %v918_v19  ;;  %vm1130_vm3 = vcmask 1045504  }
 0x7bb   :  { %v938_v30 = vsel %vm935_vm5, %v937_v18, %v933_v20  ;;  %948 = vrot.lane.b32.xlu1 %v923_v31, %s1619_s8  ;;  %v2092_v20 = vld [vmem:[%s2222_s2 + $0x38] sm:$0xff] }
 0x7bc   :  { %943 = vrot.lane.b32.xlu0 %v938_v30, %s1620_s9  ;;  %964 = vrot.lane.b32.xlu2 %v938_v30, %s1618_s1 }
 0x7bd   :  { %1158 = vmatpush.msra.mxu2 %v2092_v20 }
 0x7c3   :  { %961 = vrot.lane.b32.xlu1 %v923_v31, %s1620_s9 }
 0x7c4   :  { %957 = vrot.lane.b32.xlu0 %v1562_v41, %s1619_s8  ;;  %v2110_v41 = vld [vmem:[%s2222_s2 + $0x20] sm:$0xff] }
 0x800   :  { %v954_v13 = vpop.permute.xlu2 %953 }
 0x816   :  { %v965_v35 = vpop.permute.xlu2 %964 }
 0x82d   :  { %v949_v7 = vpop.permute.xlu1 %948 }
 0x82e   :  { %v944_v6 = vpop.permute.xlu0 %943  ;;  %v951_v10 = vsel %vm193_vm9, %v949_v7, %v938_v30  ;;  %v2104_v30 = vld [vmem:[%s2222_s2 + $0x28] sm:$0xff]  ;;  %v2122_v7 = vld [vmem:[%s2222_s2 + $0x10] sm:$0xff] }
 0x82f   :  { %v946_v32 = vsel %vm193_vm9, %v923_v31, %v944_v6  ;;  %v971_v24 = vmul.f32 %v969_v14, %v951_v10  ;;  %v2098_v31 = vld [vmem:[%s2222_s2 + $0x30] sm:$0xff]  ;;  %v2116_v6 = vld [vmem:[%s2222_s2 + $0x18] sm:$0xff] }
 0x830   :  { %1159 = vmatpush.msra.mxu2 %v2098_v31  ;;  %v1445_v10 = vpack.i.bf16 %v2098_v31, %v2092_v20  ;;  %v1455_v14 = vpack.i.bf16 %v2122_v7, %v2116_v6  ;;  %v1193_v31 = vld [vmem:[%s2223_s3 + $0x20] sm:$0x3] }
 0x832   :  { %1160 = vmatpush.msra.mxu2 %v2104_v30 }
 0x834   :  { %1161 = vmatpush.msra.mxu2 %v2110_v41 }
 0x835   :  { %v962_v34 = vpop.permute.xlu1 %961 }
 0x836   :  { %v958_v21 = vpop.permute.xlu0 %957  ;;  %v967_v39 = vsel %vm193_vm9, %v962_v34, %v965_v35  ;;  %1162 = vmatpush.msra.mxu2 %v2116_v6 }
 0x837   :  { %v960_v22 = vsel %vm193_vm9, %v954_v13, %v958_v21  ;;  %v1450_v13 = vpack.i.bf16 %v2110_v41, %v2104_v30  ;;  %v2134_v21 = vld [vmem:[%s2222_s2 + $0x8] sm:$0xff] }
 0x838   :  { %v972_v25 = vmul.f32 %v960_v22, %v946_v32  ;;  %1163 = vmatpush.msra.mxu2 %v2122_v7  ;;  %v2139_v32 = vld [vmem:[%s2222_s2] sm:$0xff] }
 0x839   :  { %v1460_v22 = vpack.i.bf16 %v2139_v32, %v2134_v21 }
 0x83a   :  { %v2064_v28 = vadd.f32 %v972_v25, %v971_v24  ;;  %1164 = vmatpush.msra.mxu2 %v2134_v21 }
 0x83c   :  { %1563 = vtanh.f32 %v2064_v28  ;;  %1165 = vmatpush.msra.mxu2 %v2139_v32 }
 0x842   :  { %v1564_v36 = vpop.eup %1563 }
 0x843   :  { %v2069_v40 = vmul.f32 %v1564_v36, %v967_v39  ;;  %v1095_v36 = vrot.slane %v2064_v28, 6  ;;  %v1123_v28 = vrot.slane %v1863_v37, 2 }
 0x845   :  { %v977_v29 = vrot.slane %v2069_v40, 4  ;;  %v1122_v44 = vsel %vm193_vm9, %v2069_v40, %v1120_v42 }
 0x846   :  { %v2076_v46 = vsel %vm1128_vm6, %v2047_v48, %v1122_v44 }
 0x847   :  { %1425 = vmatmul.msk.f32.vlgmr.msra.gmra.mxu0 %vm103_vm10, %v977_v29  ;;  %1426 = vmatmul.msk.f32.vlgmr.msra.gmra.mxu1 %vm103_vm10, %v977_v29 }
 0x8c4   :  { %v997_v49 = vpop.f32.mrf.mxu0  ;;  %v1017_v33 = vpop.f32.mrf.mxu1 }
 0x8c5   :  { %v1022_v52 = vrot.slane %v997_v49, 2  ;;  %v1023_v53 = vrot.slane %v1017_v33, 2 }
 0x8c7   :  { %v1026_v54 = vadd.f32 %v1022_v52, %v1993_v57  ;;  %v1027_v55 = vadd.f32 %v1023_v53, %v723_v50 }
 0x8c9   :  { %v1427_v60 = vmul.f32 -1.442695, %v1026_v54  ;;  %1565 = vtanh.f32 %v1026_v54  ;;  %v1428_v61 = vmul.f32 -1.442695, %v1027_v55 }
 0x8cb   :  { %1567 = vpow2.f32 %v1427_v60  ;;  %v1106_v60 = vrot.slane %v2069_v40, 2 }
 0x8cc   :  { %1569 = vpow2.f32 %v1428_v61 }
 0x8cf   :  { %v1566_v48 = vpop.eup %1565 }
 0x8d0   :  { %1079 = vrot.lane.b32.xlu2 %v1566_v48, %s1618_s1  ;;  %v1109_v48 = vrot.slane %v2038_v43, 6 }
 0x8d1   :  { %v1568_v58 = vpop.eup %1567 }
 0x8d2   :  { %v1570_v62 = vpop.eup %1569  ;;  %v1034_v45 = vadd.f32 1.0, %v1568_v58  ;;  %v1112_v58 = vrot.slane %v2013_v47, 2 }
 0x8d3   :  { %v1035_v0 = vadd.f32 1.0, %v1570_v62 }
 0x8d4   :  { %1571 = vrcp.f32 %v1034_v45  ;;  %v1047_v27 = vand.u32 2147483648, %v1034_v45  ;;  %v1045_v59 = vand.u32 2147483647, %v1034_v45  ;;  %vm1041_vm11 = vweird.f32 %v1034_v45 }
 0x8d5   :  { %1573 = vrcp.f32 %v1035_v0  ;;  %v1062_v38 = vand.u32 2147483648, %v1035_v0  ;;  %v1060_v5 = vand.u32 2147483647, %v1035_v0  ;;  %vm1056_vm13 = vweird.f32 %v1035_v0 }
 0x8d6   :  { %v1048_v11 = vor.u32 1.1754944e-38, %v1047_v27  ;;  %vm1046_vm1 = vcmp.eq.f32.partialorder %v1045_v59, 8.507059e+37  ;;  %1575 = vtanh.f32 %v1027_v55  ;;  %v1114_v47 = vsel %vm193_vm9, %v1981_v56, %v1112_v58  ;;  %v1191_v58 = vld [vmem:[%s2223_s3 + $0x10] sm:$0xff] }
 0x8d7   :  { %v1063_v12 = vor.u32 1.1754944e-38, %v1062_v38  ;;  %vm1061_vm2 = vcmp.eq.f32.partialorder %v1060_v5, 8.507059e+37 }
 0x8da   :  { %v1572_v1 = vpop.eup %1571 }
 0x8db   :  { %v1574_v2 = vpop.eup %1573  ;;  %v1037_v57 = vmul.f32 %v1572_v1, %v1034_v45  ;;  %vm1042_vm7 = vweird.f32 %v1572_v1 }
 0x8dc   :  { %v1052_v23 = vmul.f32 %v1574_v2, %v1035_v0  ;;  %vm1057_vm8 = vweird.f32 %v1574_v2  ;;  %vm1043_vm14 = vmor %vm1041_vm11, %vm1042_vm7  ;;  %v1576_v19 = vpop.eup %1575 }
 0x8dd   :  { %v1038_v26 = vsub.f32 1.0, %v1037_v57  ;;  %vm1058_vm15 = vmor %vm1056_vm13, %vm1057_vm8 }
 0x8de   :  { %v1053_v50 = vsub.f32 1.0, %v1052_v23 }
 0x8df   :  { %v1039_v3 = vmul.f32 %v1572_v1, %v1038_v26 }
 0x8e0   :  { %v1054_v4 = vmul.f32 %v1574_v2, %v1053_v50 }
 0x8e1   :  { %v1040_v8 = vadd.f32 %v1572_v1, %v1039_v3 }
 0x8e2   :  { %v1055_v9 = vadd.f32 %v1574_v2, %v1054_v4 }
 0x8e3   :  { %v1044_v15 = vsel %vm1043_vm14, %v1572_v1, %v1040_v8  ;;  %v1108_v1 = vsel %vm193_vm9, %v1905_v51, %v1106_v60 }
 0x8e4   :  { %v1059_v16 = vsel %vm1058_vm15, %v1574_v2, %v1055_v9  ;;  %v1049_v17 = vsel %vm1046_vm1, %v1048_v11, %v1044_v15  ;;  %v1111_v2 = vsel %vm193_vm9, %v1943_v63, %v1109_v48  ;;  %v1189_v9 = vld [vmem:[%s2223_s3] sm:$0xff] }
 0x8e5   :  { %v1064_v18 = vsel %vm1061_vm2, %v1063_v12, %v1059_v16  ;;  %1074 = vrot.lane.b32.xlu1 %v1049_v17, %s1619_s8  ;;  %v1190_v12 = vld [vmem:[%s2223_s3 + $0x8] sm:$0xff] }
 0x8e6   :  { %1069 = vrot.lane.b32.xlu0 %v1064_v18, %s1620_s9  ;;  %1090 = vrot.lane.b32.xlu2 %v1064_v18, %s1618_s1  ;;  %s1622_s1 = smov 120  }
 0x8ed   :  { %1087 = vrot.lane.b32.xlu1 %v1049_v17, %s1620_s9 }
 0x8ee   :  { %1083 = vrot.lane.b32.xlu0 %v1576_v19, %s1619_s8 }
 0x92a   :  { %v1080_v35 = vpop.permute.xlu2 %1079 }
 0x940   :  { %v1091_v53 = vpop.permute.xlu2 %1090 }
 0x957   :  { %v1075_v25 = vpop.permute.xlu1 %1074 }
 0x958   :  { %v1070_v24 = vpop.permute.xlu0 %1069  ;;  %v1077_v34 = vsel %vm193_vm9, %v1075_v25, %v1064_v18 }
 0x959   :  { %v1072_v42 = vsel %vm193_vm9, %v1049_v17, %v1070_v24  ;;  %v1097_v44 = vmul.f32 %v1095_v36, %v1077_v34 }
 0x95f   :  { %v1088_v52 = vpop.permute.xlu1 %1087 }
 0x960   :  { %v1084_v39 = vpop.permute.xlu0 %1083  ;;  %v1093_v55 = vsel %vm193_vm9, %v1088_v52, %v1091_v53 }
 0x961   :  { %v1086_v29 = vsel %vm193_vm9, %v1080_v35, %v1084_v39 }
 0x962   :  { %v1098_v49 = vmul.f32 %v1086_v29, %v1072_v42 }
 0x964   :  { %v1099_v33 = vadd.f32 %v1098_v49, %v1097_v44 }
 0x966   :  { %1577 = vtanh.f32 %v1099_v33 }
 0x96c   :  { %v1578_v54 = vpop.eup %1577 }
 0x96d   :  { %v1101_v61 = vmul.f32 %v1578_v54, %v1093_v55 }
 0x96f   :  { %v1103_v62 = vrot.slane %v1101_v61, 6  ;;  %v1125_v45 = vsel %vm193_vm9, %v1101_v61, %v1123_v28 }
 0x970   :  { %v2156_v0 = vsel %vm1130_vm3, %v2076_v46, %v1125_v45  ;;  %v1621_v45 = vmov 0  }
 0x971   :  { %v1105_v40 = vsel %vm193_vm9, %v1863_v37, %v1103_v62  ;;  %v2177_v37 = vld [vmem:[%s2222_s2 + $0x40] ss:$0 sm:$0xff]  ;;  %v1192_v62 = vld [vmem:[%s2223_s3 + $0x18] sm:$0xff]  ;;  %1444 = vset.pattern.permute.xlu2 %v1621_v45  ;;  %1465 = vset.pattern.permute.xlu0 %v1621_v45  ;;  %s1623_s3 = smov [#allocation2]  }
 0x972   :  { %v1127_v57 = vsel %vm1126_vm12, %v1105_v40, %v1108_v1  ;;  %vm1178_vm12 = vcmask 64512   ;;  %s1383_s10 = sshll.u32 %s1623_s3, 4  ;;  %s1384_s10 = int_to_ptr.vmem [resolvable:$true] %s1383_s10 }
 0x973   :  { %v1129_v43 = vsel %vm1128_vm6, %v1127_v57, %v1111_v2 }
 0x974   :  { %v2168_v23 = vsel %vm1130_vm3, %v1129_v43, %v1114_v47 }
 0x975   :  { %1429 = vmatmul.msk.f32.vlgmr.msra.gmra.mxu2 %vm103_vm10, %v2168_v23 }
 0x97d   :  { %1430 = vmatmul.msk.f32.gmra.mxu2 %vm103_vm10, %v2156_v0 }
 0x9f8   :  { %v1167_v51 = vpop.f32.mrf.mxu2 }
 0x9f9   :  { %1579 = vtanh.f32 %v1167_v51 }
 0x9ff   :  { %v1580_v63 = vpop.eup %1579 }
 0xa00   :  { %v1170_v56 = vpop.f32.mrf.mxu2  ;;  %v1176_v46 = vmul.f32 %v1580_v63, %v2177_v37 }
 0xa01   :  { %1581 = vtanh.f32 %v1170_v56 }
 0xa02   :  { %v1179_v26 = vsel %vm1178_vm12, %v1176_v46, 0.0 }
 0xa03   :  { %1180 = vadd.xlane.f32.xlu1 %v1179_v26 }
 0xa07   :  { %v1582_v50 = vpop.eup %1581 }
 0xa08   :  { %v1177_v27 = vmul.f32 %v1582_v50, %v2177_v37 }
 0xa0a   :  { %v1182_v38 = vsel %vm1178_vm12, %v1177_v27, 0.0 }
 0xa0b   :  { %1183 = vadd.xlane.f32.xlu0 %v1182_v38 }
 0xa1f   :  { %1350 = vrot.lane.b32.xlu0 %v2177_v37, %s1622_s1 }
 0xa76   :  { %v1181_v3 = vpop.xlane.xlu1 %1180 }
 0xa77   :  { %v1185_v4 = vmul.f32 1.442695, %v1181_v3 }
 0xa7e   :  { %v1184_v59 = vpop.xlane.xlu0 %1183 }
 0xa7f   :  { %v1187_v5 = vmul.f32 1.442695, %v1184_v59 }
 0xa81   :  { %1583 = vpow2.f32 %v1187_v5 }
 0xa82   :  { %1585 = vpow2.f32 %v1185_v4 }
 0xa87   :  { %v1584_v8 = vpop.eup %1583 }
 0xa88   :  { %1214 = vmatpush.msra.mxu3 %v1584_v8  ;;  %v1586_v11 = vpop.eup %1585 }
 0xa8a   :  { %1215 = vmatpush.msra.mxu3 %v1586_v11 }
 0xa8b   :  { %1431 = vmatmul.msk.f32.vlgmr.msra.gmra.mxu3 %vm47_vm0, %v1189_v9 }
 0xa91   :  { %v1351_v51 = vpop.permute.xlu0 %1350 }
 0xa93   :  { %1432 = vmatmul.msk.f32.gmra.mxu3 %vm47_vm0, %v1190_v12 }
 0xb0e   :  { %v1217_v15 = vpop.f32.mrf.mxu3 }
 0xb0f   :  { %1587 = vrcp.f32 %v1217_v15  ;;  %vm1228_vm4 = vweird.f32 %v1217_v15  ;;  %v1234_v39 = vand.u32 2147483648, %v1217_v15  ;;  %v1232_v49 = vand.u32 2147483647, %v1217_v15 }
 0xb11   :  { %v1235_v53 = vor.u32 1.1754944e-38, %v1234_v39  ;;  %vm1233_vm13 = vcmp.eq.f32.partialorder %v1232_v49, 8.507059e+37 }
 0xb15   :  { %v1588_v16 = vpop.eup %1587 }
 0xb16   :  { %v1224_v17 = vmul.f32 %v1588_v16, %v1217_v15  ;;  %v1220_v18 = vpop.f32.mrf.mxu3  ;;  %vm1229_vm9 = vweird.f32 %v1588_v16 }
 0xb17   :  { %1589 = vrcp.f32 %v1220_v18  ;;  %v1249_v42 = vand.u32 2147483648, %v1220_v18  ;;  %v1247_v44 = vand.u32 2147483647, %v1220_v18  ;;  %vm1230_vm6 = vmor %vm1228_vm4, %vm1229_vm9  ;;  %vm1243_vm7 = vweird.f32 %v1220_v18 }
 0xb18   :  { %v1225_v19 = vsub.f32 1.0, %v1224_v17 }
 0xb19   :  { %v1250_v54 = vor.u32 1.1754944e-38, %v1249_v42  ;;  %vm1248_vm11 = vcmp.eq.f32.partialorder %v1247_v44, 8.507059e+37 }
 0xb1a   :  { %v1226_v24 = vmul.f32 %v1588_v16, %v1225_v19 }
 0xb1c   :  { %v1227_v36 = vadd.f32 %v1588_v16, %v1226_v24 }
 0xb1d   :  { %v1590_v25 = vpop.eup %1589 }
 0xb1e   :  { %v1239_v34 = vmul.f32 %v1590_v25, %v1220_v18  ;;  %vm1244_vm5 = vweird.f32 %v1590_v25  ;;  %v1231_v52 = vsel %vm1230_vm6, %v1588_v16, %v1227_v36 }
 0xb1f   :  { %vm1245_vm8 = vmor %vm1243_vm7, %vm1244_vm5  ;;  %v1236_v61 = vsel %vm1233_vm13, %v1235_v53, %v1231_v52 }
 0xb20   :  { %v1240_v35 = vsub.f32 1.0, %v1239_v34  ;;  %v1237_v48 = vmul.f32 %v1586_v11, %v1236_v61 }
 0xb22   :  { %v1241_v29 = vmul.f32 %v1590_v25, %v1240_v35 }
 0xb24   :  { %v1242_v33 = vadd.f32 %v1590_v25, %v1241_v29 }
 0xb26   :  { %v1246_v55 = vsel %vm1245_vm8, %v1590_v25, %v1242_v33 }
 0xb27   :  { %v1251_v60 = vsel %vm1248_vm11, %v1250_v54, %v1246_v55 }
 0xb28   :  { %v1252_v28 = vmul.f32 %v1584_v8, %v1251_v60 }
 0xb2a   :  { %1273 = vmatpush.msrb.mxu0 %v1252_v28 }
 0xb2c   :  { %1274 = vmatpush.msrb.mxu0 %v1237_v48 }
 0xb2d   :  { %1433 = vmatmul.msk.f32.vlgmr.msrb.gmra.mxu0 %vm47_vm0, %v1191_v58 }
 0xb35   :  { %1434 = vmatmul.msk.f32.gmra.mxu0 %vm47_vm0, %v1192_v62 }
 0xbaa   :  { %v1276_v1 = vpop.f32.mrf.mxu0 }
 0xbb2   :  { %v1279_v40 = vpop.f32.mrf.mxu0 }
 0xbb3   :  { %1289 = vperm.xlu2 %1444, %v1279_v40  }
 0xbbb   :  { %1284 = vperm.xlu2 %1444, %v1276_v1  }
 0xbc3   :  { %1446 = vrot.lane.b32.xlu2 %v1445_v10, %s1622_s1 }
 0xbcb   :  { %1451 = vrot.lane.b32.xlu2 %v1450_v13, %s1622_s1 }
 0xbd3   :  { %1456 = vrot.lane.b32.xlu2 %v1455_v14, %s1622_s1 }
 0xbdb   :  { %1461 = vrot.lane.b32.xlu2 %v1460_v22, %s1622_s1 }
 0xc0d   :  { %v1290_v2 = vpop.permute.xlu2 %1289 }
 0xc0e   :  { %v1293_v57 = vmul.f32 %v1290_v2, %v2156_v0 }
 0xc10   :  { %1311 = vmatpush.msrb.mxu1 %v1293_v57 }
 0xc15   :  { %v1285_v47 = vpop.permute.xlu2 %1284 }
 0xc16   :  { %v1292_v20 = vmul.f32 %v1285_v47, %v2168_v23 }
 0xc18   :  { %1312 = vmatpush.msrb.mxu1 %v1292_v20 }
 0xc19   :  { %1435 = vmatmul.msk.f32.vlgmr.msrb.gmra.mxu1 %vm47_vm0, %v1193_v31  ;;  %vm1376_vm0 = vcmask 33792  }
 0xc1d   :  { %v1447_v30 = vpop.permute.xlu2 %1446 }
 0xc1e   :  { %v1449_v41 = vunpack.i.h.bf16 %v1447_v30  ;;  %v1448_v6 = vunpack.i.l.bf16 %v1447_v30 }
 0xc20   :  { %1364 = vmatpush.msrb.mxu3 %v1448_v6 }
 0xc22   :  { %1365 = vmatpush.msrb.mxu3 %v1449_v41 }
 0xc25   :  { %v1452_v7 = vpop.permute.xlu2 %1451 }
 0xc26   :  { %v1454_v10 = vunpack.i.h.bf16 %v1452_v7  ;;  %v1453_v13 = vunpack.i.l.bf16 %v1452_v7 }
 0xc28   :  { %1366 = vmatpush.msrb.mxu3 %v1453_v13 }
 0xc2a   :  { %1367 = vmatpush.msrb.mxu3 %v1454_v10 }
 0xc2d   :  { %v1457_v14 = vpop.permute.xlu2 %1456 }
 0xc2e   :  { %v1459_v21 = vunpack.i.h.bf16 %v1457_v14  ;;  %v1458_v32 = vunpack.i.l.bf16 %v1457_v14 }
 0xc30   :  { %1368 = vmatpush.msrb.mxu3 %v1458_v32 }
 0xc32   :  { %1369 = vmatpush.msrb.mxu3 %v1459_v21 }
 0xc35   :  { %v1462_v22 = vpop.permute.xlu2 %1461 }
 0xc36   :  { %v1464_v0 = vunpack.i.h.bf16 %v1462_v22  ;;  %v1463_v43 = vunpack.i.l.bf16 %v1462_v22 }
 0xc38   :  { %1370 = vmatpush.msrb.mxu3 %v1463_v43 }
 0xc3a   :  { %1371 = vmatpush.msrb.mxu3 %v1464_v0 }
 0xc96   :  { %v1314_v23 = vpop.f32.mrf.mxu1 }
 0xc97   :  { %1436 = vmatmul.msk.f32.vlgmr.msrb.gmra.mxu3 %vm103_vm10, %v1314_v23 }
 0xd1a   :  { %v1373_v37 = vpop.f32.mrf.mxu3 }
 0xd1b   :  { %v1374_v63 = vadd.f32 %v1373_v37, %v1351_v51 }
 0xd1d   :  { %1377 = vst.msk [vmem:[#allocation2] sm:$0x3] %vm1376_vm0, %v1374_v63 }
 0xd1e   :  { %1388 = dma.vmem_to_hbm [thread:$0]  %s1384_s10, 32, %s1386_s13, [#allocation3]  }
 0xd1f   :  { %1615 = dma.done.wait [#allocation3], 32  }
 0xd20   :  { %1616 = vsyncadd [#allocation3], 4294967264 }
 0xd21   :  { %1393 = vsyncpa [#allocation3], 1 }

</bundles_post_ra>
